<compile_context>
chip_gen: v5e
topology: v5e:2x2
jax: 0.10.0
libtpu: 0.0.40
codegen_flags: <defaults>
</compile_context>

<pallas_src>
import functools

import jax
import jax.numpy as jnp
from jax import lax
from jax.experimental import pallas as pl
from jax.experimental.pallas import tpu as pltpu

MOMENTUM = 0.9
SPARSITY_LAMBDA = 0.05
_EPS = 1e-6


# ----------------------------------------------------------------------------
# In-kernel helpers (traced Python, run once inside the fused kernel body)
# ----------------------------------------------------------------------------
def _shift_matrix(L, off):
    """(L, L) matrix S with S[j, l] = 1 iff j == l + off, so that
    (x @ S)[:, l] = x[:, l + off] with implicit zero padding.  Implements the
    +/-1 taps of a k=3 'same' Conv1d as MXU matmuls (no im2col, no slicing)."""
    r = lax.broadcasted_iota(jnp.int32, (L, L), 0)
    c = lax.broadcasted_iota(jnp.int32, (L, L), 1)
    return (r == c + off).astype(jnp.float32)


def _conv3(x, w_ref, b_ref, s_m1, s_p1, relu):
    """Conv1d(kernel=3, padding=same) in NCL layout.

    x: (C_in, L) value; w_ref: (3, C_out, C_in) ref; b_ref: (C_out, 1) ref.
    Returns (C_out, L)."""
    t0 = jnp.dot(w_ref[0], x, preferred_element_type=jnp.float32)  # tap l-1
    t1 = jnp.dot(w_ref[1], x, preferred_element_type=jnp.float32)  # tap l
    t2 = jnp.dot(w_ref[2], x, preferred_element_type=jnp.float32)  # tap l+1
    y = (t1
         + jnp.dot(t0, s_m1, preferred_element_type=jnp.float32)
         + jnp.dot(t2, s_p1, preferred_element_type=jnp.float32)
         + b_ref[...])
    if relu:
        y = jnp.maximum(y, 0.0)
    return y


def _encode(x_ref, ew1, eb1, ew2, eb2, s_m1, s_p1, B):
    """Denoising encoder stand-in: two k=3 convs; returns skip h1 and latent."""
    h1s, lats = [], []
    for b in range(B):
        xb = x_ref[b]                                          # (C_in, L)
        h1 = _conv3(xb, ew1, eb1, s_m1, s_p1, relu=True)       # (C_hid, L)
        lat = _conv3(h1, ew2, eb2, s_m1, s_p1, relu=False)     # (C_lat, L)
        h1s.append(h1)
        lats.append(lat)
    return h1s, lats


def _decode(dec_in, h1s, dw1, db1, dw2, db2, s_m1, s_p1, recon_ref, B):
    """Denoising decoder stand-in: conv + skip connection + conv."""
    for b in range(B):
        h = _conv3(dec_in[b], dw1, db1, s_m1, s_p1, relu=True) + h1s[b]
        out_b = _conv3(h, dw2, db2, s_m1, s_p1, relu=False)    # (C_in, L)
        recon_ref[b] = out_b.astype(recon_ref.dtype)


# ----------------------------------------------------------------------------
# Fused kernels
# ----------------------------------------------------------------------------
def _denoise_kernel(x_ref, ew1, eb1, ew2, eb2, dw1, db1, dw2, db2,
                    recon_ref, *, B, L):
    s_m1 = _shift_matrix(L, -1)
    s_p1 = _shift_matrix(L, 1)
    h1s, lats = _encode(x_ref, ew1, eb1, ew2, eb2, s_m1, s_p1, B)
    _decode(lats, h1s, dw1, db1, dw2, db2, s_m1, s_p1, recon_ref, B)


def _sparse_kernel(x_ref, ew1, eb1, ew2, eb2, dw1, db1, dw2, db2,
                   sew, seb, sdw, sdb, rm_ref,
                   recon_ref, loss_ref, rm_out_ref,
                   *, B, L, momentum, target, num_rm_updates):
    s_m1 = _shift_matrix(L, -1)
    s_p1 = _shift_matrix(L, 1)

    # ---- denoising encoder (skip h1 stays resident in vregs) ----
    h1s, lats = _encode(x_ref, ew1, eb1, ew2, eb2, s_m1, s_p1, B)

    # ---- sparse AE on the flattened (B * C_lat, L) rows, kept per-batch ----
    c_lat = lats[0].shape[0]
    enc = []
    act_sum = None
    for b in range(B):
        e = jnp.maximum(
            jnp.dot(lats[b], sew[...], preferred_element_type=jnp.float32)
            + seb[...], 0.0)                                    # (C_lat, H)
        enc.append(e)
        s = jnp.sum(e, axis=0, keepdims=True)                   # (1, H)
        act_sum = s if act_sum is None else act_sum + s
    act_mean = act_sum * (1.0 / (B * c_lat))                    # mean over B*C rows

    # Running-mean EMA applied num_rm_updates times (forward_sparse is called
    # twice on the inference sparse path).  Identical activation mean per call
    # collapses exactly to one step with momentum ** n.
    mn = momentum ** num_rm_updates
    r = mn * rm_ref[...] + (1.0 - mn) * act_mean                # (1, H)
    rm_out_ref[...] = r

    # Bernoulli KL sparsity loss on sigmoid(running mean), clamped for safety.
    p = jnp.clip(jax.nn.sigmoid(r), _EPS, 1.0 - _EPS)
    kl = p * jnp.log(p / target) + (1.0 - p) * jnp.log((1.0 - p) / (1.0 - target))
    loss_ref[...] = jnp.sum(kl, keepdims=True)                  # (1, 1)

    # sparse decoder -> per-batch (C_lat, L) reconstruction of the latent
    dec_in = [
        jnp.dot(enc[b], sdw[...], preferred_element_type=jnp.float32) + sdb[...]
        for b in range(B)
    ]

    # ---- denoising decoder with skip connection ----
    _decode(dec_in, h1s, dw1, db1, dw2, db2, s_m1, s_p1, recon_ref, B)


# ----------------------------------------------------------------------------
# pallas_call wrappers
# ----------------------------------------------------------------------------
def _fs(shape):
    """Full-array BlockSpec for a grid=(1,) launch."""
    return pl.BlockSpec(shape, lambda i: (0,) * len(shape))


def fused_denoise_forward(params, x):
    B, C_in, L = x.shape
    inputs = (x,
              params["enc_conv1_w"], params["enc_conv1_b"],
              params["enc_conv2_w"], params["enc_conv2_b"],
              params["dec_conv1_w"], params["dec_conv1_b"],
              params["dec_conv2_w"], params["dec_conv2_b"])
    return pl.pallas_call(
        functools.partial(_denoise_kernel, B=B, L=L),
        out_shape=jax.ShapeDtypeStruct((B, C_in, L), jnp.float32),
        grid=(1,),
        in_specs=[_fs(a.shape) for a in inputs],
        out_specs=_fs((B, C_in, L)),
        compiler_params=pltpu.CompilerParams(dimension_semantics=("arbitrary",)),
    )(*inputs)


def fused_sparse_forward(params, x, num_rm_updates=2):
    B, C_in, L = x.shape
    H = params["sp_enc_w"].shape[1]
    rm = params["infer_running_mean"].reshape(1, H)
    inputs = (x,
              params["enc_conv1_w"], params["enc_conv1_b"],
              params["enc_conv2_w"], params["enc_conv2_b"],
              params["dec_conv1_w"], params["dec_conv1_b"],
              params["dec_conv2_w"], params["dec_conv2_b"],
              params["sp_enc_w"], params["sp_enc_b"],
              params["sp_dec_w"], params["sp_dec_b"],
              rm)
    recon, loss, new_rm = pl.pallas_call(
        functools.partial(_sparse_kernel, B=B, L=L,
                          momentum=MOMENTUM, target=SPARSITY_LAMBDA,
                          num_rm_updates=num_rm_updates),
        out_shape=(jax.ShapeDtypeStruct((B, C_in, L), jnp.float32),
                   jax.ShapeDtypeStruct((1, 1), jnp.float32),
                   jax.ShapeDtypeStruct((1, H), jnp.float32)),
        grid=(1,),
        in_specs=[_fs(a.shape) for a in inputs],
        out_specs=(_fs((B, C_in, L)), _fs((1, 1)), _fs((1, H))),
        compiler_params=pltpu.CompilerParams(dimension_semantics=("arbitrary",)),
    )(*inputs)
    return recon, loss, new_rm


# ----------------------------------------------------------------------------
# Parameter construction (deterministic, synthetic stand-in weights)
# ----------------------------------------------------------------------------
def init_params(key, c_in=4, c_hidden=8, c_latent=4, seq_len=16,
                sparse_hidden=32):
    ks = jax.random.split(key, 6)
    s = 0.1
    return {
        # denoising encoder (TODO(synk): exact DenoisingEncoder arch not in source)
        "enc_conv1_w": s * jax.random.normal(ks[0], (3, c_hidden, c_in), jnp.float32),
        "enc_conv1_b": jnp.zeros((c_hidden, 1), jnp.float32),
        "enc_conv2_w": s * jax.random.normal(ks[1], (3, c_latent, c_hidden), jnp.float32),
        "enc_conv2_b": jnp.zeros((c_latent, 1), jnp.float32),
        # denoising decoder (TODO(synk): exact DenoisingDecoder arch not in source)
        "dec_conv1_w": s * jax.random.normal(ks[2], (3, c_hidden, c_latent), jnp.float32),
        "dec_conv1_b": jnp.zeros((c_hidden, 1), jnp.float32),
        "dec_conv2_w": s * jax.random.normal(ks[3], (3, c_in, c_hidden), jnp.float32),
        "dec_conv2_b": jnp.zeros((c_in, 1), jnp.float32),
        # sparse AE (TODO(synk): SparseEncoder/Decoder assumed Linear(+ReLU) / Linear)
        "sp_enc_w": s * jax.random.normal(ks[4], (seq_len, sparse_hidden), jnp.float32),
        "sp_enc_b": jnp.zeros((1, sparse_hidden), jnp.float32),
        "sp_dec_w": s * jax.random.normal(ks[5], (sparse_hidden, seq_len), jnp.float32),
        "sp_dec_b": jnp.zeros((1, seq_len), jnp.float32),
        "infer_running_mean": jnp.zeros((sparse_hidden,), jnp.float32),
        "train_running_mean": jnp.zeros((sparse_hidden,), jnp.float32),
    }


# ----------------------------------------------------------------------------
# Module forward (DenoisingSparseAE.forward, inference paths: is_train_mode=0)
# ----------------------------------------------------------------------------
def denoising_sparse_ae_forward(params, x, time_stamp=None, curr_epoch=0,
                                total_epoch=10, is_train_mode=0):
    # apply_timeEmbedding = False -> time_embedder is None -> time_stamp unused.
    del time_stamp, is_train_mode
    train_sparse_flag = curr_epoch > total_epoch * (2.0 / 3.0)
    if not train_sparse_flag:
        recon = fused_denoise_forward(params, x)
        return recon, None, params["infer_running_mean"]
    # Inference sparse path: forward_sparse is invoked twice in the reference
    # (running-mean EMA applied twice; the second call's outputs are returned).
    recon, loss, new_rm = fused_sparse_forward(params, x, num_rm_updates=2)
    return recon, loss[0, 0], new_rm.reshape(-1)


# ----------------------------------------------------------------------------
if __name__ == "__main__":
    B, C_IN, L = 2, 4, 16
    key = jax.random.PRNGKey(0)
    k_x, k_t, k_p = jax.random.split(key, 3)

    params = init_params(k_p, c_in=C_IN, c_hidden=8, c_latent=4,
                         seq_len=L, sparse_hidden=32)
    x = jax.random.normal(k_x, (B, C_IN, L), jnp.float32)
    time_stamp = jax.random.uniform(k_t, (B, 1), jnp.float32)

    # sparse inference path (curr_epoch > 2/3 total_epoch)
    recon, sparsity_loss, new_rm = denoising_sparse_ae_forward(
        params, x, time_stamp, curr_epoch=8, total_epoch=10, is_train_mode=0)
    recon = jax.block_until_ready(recon)
    sparsity_loss = jax.block_until_ready(sparsity_loss)
    new_rm = jax.block_until_ready(new_rm)

    # denoise-only inference path (default epochs)
    recon_dn, loss_dn, _ = denoising_sparse_ae_forward(
        params, x, time_stamp, curr_epoch=0, total_epoch=10, is_train_mode=0)
    recon_dn = jax.block_until_ready(recon_dn)

    assert recon.shape == (B, C_IN, L)
    assert recon_dn.shape == (B, C_IN, L)
    assert sparsity_loss.shape == ()
    assert new_rm.shape == (32,)
    assert loss_dn is None
    assert bool(jnp.all(jnp.isfinite(recon))) and bool(jnp.isfinite(sparsity_loss))
    print("KERNEL_OK")
</pallas_src>

<mosaic_0001>
module attributes {stable_mosaic.version = 11 : i64} {
  func.func @_sparse_kernel(%arg0: i32, %arg1: memref<2x4x16xf32, #tpu.memory_space<vmem>>, %arg2: memref<3x8x4xf32, #tpu.memory_space<vmem>>, %arg3: memref<8x1xf32, #tpu.memory_space<vmem>>, %arg4: memref<3x4x8xf32, #tpu.memory_space<vmem>>, %arg5: memref<4x1xf32, #tpu.memory_space<vmem>>, %arg6: memref<3x8x4xf32, #tpu.memory_space<vmem>>, %arg7: memref<8x1xf32, #tpu.memory_space<vmem>>, %arg8: memref<3x4x8xf32, #tpu.memory_space<vmem>>, %arg9: memref<4x1xf32, #tpu.memory_space<vmem>>, %arg10: memref<16x32xf32, #tpu.memory_space<vmem>>, %arg11: memref<1x32xf32, #tpu.memory_space<vmem>>, %arg12: memref<32x16xf32, #tpu.memory_space<vmem>>, %arg13: memref<1x16xf32, #tpu.memory_space<vmem>>, %arg14: memref<1x32xf32, #tpu.memory_space<vmem>>, %arg15: memref<2x4x16xf32, #tpu.memory_space<vmem>>, %arg16: memref<1x1xf32, #tpu.memory_space<vmem>>, %arg17: memref<1x32xf32, #tpu.memory_space<vmem>>) attributes {dimension_semantics = [#tpu.dimension_semantics<arbitrary>], iteration_bounds = array<i64: 1>, scalar_prefetch = 0 : i64, scratch_operands = 0 : i64, tpu.core_type = #tpu.core_type<tc>, window_params = [{pipeline_mode = #tpu.pipeline_mode<synchronous>, transform_indices = @transform_0, window_bounds = array<i64: 2, 4, 16>}, {pipeline_mode = #tpu.pipeline_mode<synchronous>, transform_indices = @transform_1, window_bounds = array<i64: 3, 8, 4>}, {pipeline_mode = #tpu.pipeline_mode<synchronous>, transform_indices = @transform_2, window_bounds = array<i64: 8, 1>}, {pipeline_mode = #tpu.pipeline_mode<synchronous>, transform_indices = @transform_3, window_bounds = array<i64: 3, 4, 8>}, {pipeline_mode = #tpu.pipeline_mode<synchronous>, transform_indices = @transform_4, window_bounds = array<i64: 4, 1>}, {pipeline_mode = #tpu.pipeline_mode<synchronous>, transform_indices = @transform_5, window_bounds = array<i64: 3, 8, 4>}, {pipeline_mode = #tpu.pipeline_mode<synchronous>, transform_indices = @transform_6, window_bounds = array<i64: 8, 1>}, {pipeline_mode = #tpu.pipeline_mode<synchronous>, transform_indices = @transform_7, window_bounds = array<i64: 3, 4, 8>}, {pipeline_mode = #tpu.pipeline_mode<synchronous>, transform_indices = @transform_8, window_bounds = array<i64: 4, 1>}, {pipeline_mode = #tpu.pipeline_mode<synchronous>, transform_indices = @transform_9, window_bounds = array<i64: 16, 32>}, {pipeline_mode = #tpu.pipeline_mode<synchronous>, transform_indices = @transform_10, window_bounds = array<i64: 1, 32>}, {pipeline_mode = #tpu.pipeline_mode<synchronous>, transform_indices = @transform_11, window_bounds = array<i64: 32, 16>}, {pipeline_mode = #tpu.pipeline_mode<synchronous>, transform_indices = @transform_12, window_bounds = array<i64: 1, 16>}, {pipeline_mode = #tpu.pipeline_mode<synchronous>, transform_indices = @transform_13, window_bounds = array<i64: 1, 32>}, {pipeline_mode = #tpu.pipeline_mode<synchronous>, transform_indices = @transform_14, window_bounds = array<i64: 2, 4, 16>}, {pipeline_mode = #tpu.pipeline_mode<synchronous>, transform_indices = @transform_15, window_bounds = array<i64: 1, 1>}, {pipeline_mode = #tpu.pipeline_mode<synchronous>, transform_indices = @transform_16, window_bounds = array<i64: 1, 32>}]} {
    %0 = tpu.iota {dimensions = array<i32: 0>} : vector<16x16xi32>
    %1 = tpu.iota {dimensions = array<i32: 1>} : vector<16x16xi32>
    %c-1_i32 = arith.constant -1 : i32
    %2 = vector.broadcast %c-1_i32 : i32 to vector<16x16xi32>
    %3 = arith.addi %1, %2 : vector<16x16xi32>
    %4 = arith.cmpi eq, %0, %3 : vector<16x16xi32>
    %5 = arith.extui %4 : vector<16x16xi1> to vector<16x16xi32>
    %6 = arith.sitofp %5 : vector<16x16xi32> to vector<16x16xf32>
    %7 = tpu.iota {dimensions = array<i32: 0>} : vector<16x16xi32>
    %8 = tpu.iota {dimensions = array<i32: 1>} : vector<16x16xi32>
    %c1_i32 = arith.constant 1 : i32
    %9 = vector.broadcast %c1_i32 : i32 to vector<16x16xi32>
    %10 = arith.addi %8, %9 : vector<16x16xi32>
    %11 = arith.cmpi eq, %7, %10 : vector<16x16xi32>
    %12 = arith.extui %11 : vector<16x16xi1> to vector<16x16xi32>
    %13 = arith.sitofp %12 : vector<16x16xi32> to vector<16x16xf32>
    %c0 = arith.constant 0 : index
    %c0_0 = arith.constant 0 : index
    %c0_1 = arith.constant 0 : index
    %14 = vector.load %arg1[%c0, %c0_0, %c0_1] : memref<2x4x16xf32, #tpu.memory_space<vmem>>, vector<1x4x16xf32>
    %15 = vector.shape_cast %14 : vector<1x4x16xf32> to vector<4x16xf32>
    %c0_2 = arith.constant 0 : index
    %c0_3 = arith.constant 0 : index
    %c0_4 = arith.constant 0 : index
    %16 = vector.load %arg2[%c0_2, %c0_3, %c0_4] : memref<3x8x4xf32, #tpu.memory_space<vmem>>, vector<1x8x4xf32>
    %17 = vector.shape_cast %16 : vector<1x8x4xf32> to vector<8x4xf32>
    %cst = arith.constant dense<0.000000e+00> : vector<8x16xf32>
    %18 = tpu.matmul %17, %15, %cst {dimension_numbers = #tpu.dot_dimension_numbers<[1], [0], [0], [1], [0, 0, 1, 1], [], []>} : vector<8x4xf32>, vector<4x16xf32>, vector<8x16xf32> -> vector<8x16xf32>
    %c1 = arith.constant 1 : index
    %c0_5 = arith.constant 0 : index
    %c0_6 = arith.constant 0 : index
    %19 = vector.load %arg2[%c1, %c0_5, %c0_6] : memref<3x8x4xf32, #tpu.memory_space<vmem>>, vector<1x8x4xf32>
    %20 = vector.shape_cast %19 : vector<1x8x4xf32> to vector<8x4xf32>
    %cst_7 = arith.constant dense<0.000000e+00> : vector<8x16xf32>
    %21 = tpu.matmul %20, %15, %cst_7 {dimension_numbers = #tpu.dot_dimension_numbers<[1], [0], [0], [1], [0, 0, 1, 1], [], []>} : vector<8x4xf32>, vector<4x16xf32>, vector<8x16xf32> -> vector<8x16xf32>
    %c2 = arith.constant 2 : index
    %c0_8 = arith.constant 0 : index
    %c0_9 = arith.constant 0 : index
    %22 = vector.load %arg2[%c2, %c0_8, %c0_9] : memref<3x8x4xf32, #tpu.memory_space<vmem>>, vector<1x8x4xf32>
    %23 = vector.shape_cast %22 : vector<1x8x4xf32> to vector<8x4xf32>
    %cst_10 = arith.constant dense<0.000000e+00> : vector<8x16xf32>
    %24 = tpu.matmul %23, %15, %cst_10 {dimension_numbers = #tpu.dot_dimension_numbers<[1], [0], [0], [1], [0, 0, 1, 1], [], []>} : vector<8x4xf32>, vector<4x16xf32>, vector<8x16xf32> -> vector<8x16xf32>
    %cst_11 = arith.constant dense<0.000000e+00> : vector<8x16xf32>
    %25 = tpu.matmul %18, %6, %cst_11 {dimension_numbers = #tpu.dot_dimension_numbers<[1], [0], [0], [1], [0, 0, 1, 1], [], []>} : vector<8x16xf32>, vector<16x16xf32>, vector<8x16xf32> -> vector<8x16xf32>
    %26 = arith.addf %21, %25 : vector<8x16xf32>
    %cst_12 = arith.constant dense<0.000000e+00> : vector<8x16xf32>
    %27 = tpu.matmul %24, %13, %cst_12 {dimension_numbers = #tpu.dot_dimension_numbers<[1], [0], [0], [1], [0, 0, 1, 1], [], []>} : vector<8x16xf32>, vector<16x16xf32>, vector<8x16xf32> -> vector<8x16xf32>
    %28 = arith.addf %26, %27 : vector<8x16xf32>
    %c0_13 = arith.constant 0 : index
    %c0_14 = arith.constant 0 : index
    %29 = vector.load %arg3[%c0_13, %c0_14] : memref<8x1xf32, #tpu.memory_space<vmem>>, vector<8x1xf32>
    %30 = vector.broadcast %29 : vector<8x1xf32> to vector<8x16xf32>
    %31 = arith.addf %28, %30 : vector<8x16xf32>
    %cst_15 = arith.constant 0.000000e+00 : f32
    %32 = vector.broadcast %cst_15 : f32 to vector<8x16xf32>
    %33 = arith.maximumf %31, %32 : vector<8x16xf32>
    %c0_16 = arith.constant 0 : index
    %c0_17 = arith.constant 0 : index
    %c0_18 = arith.constant 0 : index
    %34 = vector.load %arg4[%c0_16, %c0_17, %c0_18] : memref<3x4x8xf32, #tpu.memory_space<vmem>>, vector<1x4x8xf32>
    %35 = vector.shape_cast %34 : vector<1x4x8xf32> to vector<4x8xf32>
    %cst_19 = arith.constant dense<0.000000e+00> : vector<4x16xf32>
    %36 = tpu.matmul %35, %33, %cst_19 {dimension_numbers = #tpu.dot_dimension_numbers<[1], [0], [0], [1], [0, 0, 1, 1], [], []>} : vector<4x8xf32>, vector<8x16xf32>, vector<4x16xf32> -> vector<4x16xf32>
    %c1_20 = arith.constant 1 : index
    %c0_21 = arith.constant 0 : index
    %c0_22 = arith.constant 0 : index
    %37 = vector.load %arg4[%c1_20, %c0_21, %c0_22] : memref<3x4x8xf32, #tpu.memory_space<vmem>>, vector<1x4x8xf32>
    %38 = vector.shape_cast %37 : vector<1x4x8xf32> to vector<4x8xf32>
    %cst_23 = arith.constant dense<0.000000e+00> : vector<4x16xf32>
    %39 = tpu.matmul %38, %33, %cst_23 {dimension_numbers = #tpu.dot_dimension_numbers<[1], [0], [0], [1], [0, 0, 1, 1], [], []>} : vector<4x8xf32>, vector<8x16xf32>, vector<4x16xf32> -> vector<4x16xf32>
    %c2_24 = arith.constant 2 : index
    %c0_25 = arith.constant 0 : index
    %c0_26 = arith.constant 0 : index
    %40 = vector.load %arg4[%c2_24, %c0_25, %c0_26] : memref<3x4x8xf32, #tpu.memory_space<vmem>>, vector<1x4x8xf32>
    %41 = vector.shape_cast %40 : vector<1x4x8xf32> to vector<4x8xf32>
    %cst_27 = arith.constant dense<0.000000e+00> : vector<4x16xf32>
    %42 = tpu.matmul %41, %33, %cst_27 {dimension_numbers = #tpu.dot_dimension_numbers<[1], [0], [0], [1], [0, 0, 1, 1], [], []>} : vector<4x8xf32>, vector<8x16xf32>, vector<4x16xf32> -> vector<4x16xf32>
    %cst_28 = arith.constant dense<0.000000e+00> : vector<4x16xf32>
    %43 = tpu.matmul %36, %6, %cst_28 {dimension_numbers = #tpu.dot_dimension_numbers<[1], [0], [0], [1], [0, 0, 1, 1], [], []>} : vector<4x16xf32>, vector<16x16xf32>, vector<4x16xf32> -> vector<4x16xf32>
    %44 = arith.addf %39, %43 : vector<4x16xf32>
    %cst_29 = arith.constant dense<0.000000e+00> : vector<4x16xf32>
    %45 = tpu.matmul %42, %13, %cst_29 {dimension_numbers = #tpu.dot_dimension_numbers<[1], [0], [0], [1], [0, 0, 1, 1], [], []>} : vector<4x16xf32>, vector<16x16xf32>, vector<4x16xf32> -> vector<4x16xf32>
    %46 = arith.addf %44, %45 : vector<4x16xf32>
    %c0_30 = arith.constant 0 : index
    %c0_31 = arith.constant 0 : index
    %47 = vector.load %arg5[%c0_30, %c0_31] : memref<4x1xf32, #tpu.memory_space<vmem>>, vector<4x1xf32>
    %48 = vector.broadcast %47 : vector<4x1xf32> to vector<4x16xf32>
    %49 = arith.addf %46, %48 : vector<4x16xf32>
    %c1_32 = arith.constant 1 : index
    %c0_33 = arith.constant 0 : index
    %c0_34 = arith.constant 0 : index
    %50 = vector.load %arg1[%c1_32, %c0_33, %c0_34] : memref<2x4x16xf32, #tpu.memory_space<vmem>>, vector<1x4x16xf32>
    %51 = vector.shape_cast %50 : vector<1x4x16xf32> to vector<4x16xf32>
    %c0_35 = arith.constant 0 : index
    %c0_36 = arith.constant 0 : index
    %c0_37 = arith.constant 0 : index
    %52 = vector.load %arg2[%c0_35, %c0_36, %c0_37] : memref<3x8x4xf32, #tpu.memory_space<vmem>>, vector<1x8x4xf32>
    %53 = vector.shape_cast %52 : vector<1x8x4xf32> to vector<8x4xf32>
    %cst_38 = arith.constant dense<0.000000e+00> : vector<8x16xf32>
    %54 = tpu.matmul %53, %51, %cst_38 {dimension_numbers = #tpu.dot_dimension_numbers<[1], [0], [0], [1], [0, 0, 1, 1], [], []>} : vector<8x4xf32>, vector<4x16xf32>, vector<8x16xf32> -> vector<8x16xf32>
    %c1_39 = arith.constant 1 : index
    %c0_40 = arith.constant 0 : index
    %c0_41 = arith.constant 0 : index
    %55 = vector.load %arg2[%c1_39, %c0_40, %c0_41] : memref<3x8x4xf32, #tpu.memory_space<vmem>>, vector<1x8x4xf32>
    %56 = vector.shape_cast %55 : vector<1x8x4xf32> to vector<8x4xf32>
    %cst_42 = arith.constant dense<0.000000e+00> : vector<8x16xf32>
    %57 = tpu.matmul %56, %51, %cst_42 {dimension_numbers = #tpu.dot_dimension_numbers<[1], [0], [0], [1], [0, 0, 1, 1], [], []>} : vector<8x4xf32>, vector<4x16xf32>, vector<8x16xf32> -> vector<8x16xf32>
    %c2_43 = arith.constant 2 : index
    %c0_44 = arith.constant 0 : index
    %c0_45 = arith.constant 0 : index
    %58 = vector.load %arg2[%c2_43, %c0_44, %c0_45] : memref<3x8x4xf32, #tpu.memory_space<vmem>>, vector<1x8x4xf32>
    %59 = vector.shape_cast %58 : vector<1x8x4xf32> to vector<8x4xf32>
    %cst_46 = arith.constant dense<0.000000e+00> : vector<8x16xf32>
    %60 = tpu.matmul %59, %51, %cst_46 {dimension_numbers = #tpu.dot_dimension_numbers<[1], [0], [0], [1], [0, 0, 1, 1], [], []>} : vector<8x4xf32>, vector<4x16xf32>, vector<8x16xf32> -> vector<8x16xf32>
    %cst_47 = arith.constant dense<0.000000e+00> : vector<8x16xf32>
    %61 = tpu.matmul %54, %6, %cst_47 {dimension_numbers = #tpu.dot_dimension_numbers<[1], [0], [0], [1], [0, 0, 1, 1], [], []>} : vector<8x16xf32>, vector<16x16xf32>, vector<8x16xf32> -> vector<8x16xf32>
    %62 = arith.addf %57, %61 : vector<8x16xf32>
    %cst_48 = arith.constant dense<0.000000e+00> : vector<8x16xf32>
    %63 = tpu.matmul %60, %13, %cst_48 {dimension_numbers = #tpu.dot_dimension_numbers<[1], [0], [0], [1], [0, 0, 1, 1], [], []>} : vector<8x16xf32>, vector<16x16xf32>, vector<8x16xf32> -> vector<8x16xf32>
    %64 = arith.addf %62, %63 : vector<8x16xf32>
    %c0_49 = arith.constant 0 : index
    %c0_50 = arith.constant 0 : index
    %65 = vector.load %arg3[%c0_49, %c0_50] : memref<8x1xf32, #tpu.memory_space<vmem>>, vector<8x1xf32>
    %66 = vector.broadcast %65 : vector<8x1xf32> to vector<8x16xf32>
    %67 = arith.addf %64, %66 : vector<8x16xf32>
    %cst_51 = arith.constant 0.000000e+00 : f32
    %68 = vector.broadcast %cst_51 : f32 to vector<8x16xf32>
    %69 = arith.maximumf %67, %68 : vector<8x16xf32>
    %c0_52 = arith.constant 0 : index
    %c0_53 = arith.constant 0 : index
    %c0_54 = arith.constant 0 : index
    %70 = vector.load %arg4[%c0_52, %c0_53, %c0_54] : memref<3x4x8xf32, #tpu.memory_space<vmem>>, vector<1x4x8xf32>
    %71 = vector.shape_cast %70 : vector<1x4x8xf32> to vector<4x8xf32>
    %cst_55 = arith.constant dense<0.000000e+00> : vector<4x16xf32>
    %72 = tpu.matmul %71, %69, %cst_55 {dimension_numbers = #tpu.dot_dimension_numbers<[1], [0], [0], [1], [0, 0, 1, 1], [], []>} : vector<4x8xf32>, vector<8x16xf32>, vector<4x16xf32> -> vector<4x16xf32>
    %c1_56 = arith.constant 1 : index
    %c0_57 = arith.constant 0 : index
    %c0_58 = arith.constant 0 : index
    %73 = vector.load %arg4[%c1_56, %c0_57, %c0_58] : memref<3x4x8xf32, #tpu.memory_space<vmem>>, vector<1x4x8xf32>
    %74 = vector.shape_cast %73 : vector<1x4x8xf32> to vector<4x8xf32>
    %cst_59 = arith.constant dense<0.000000e+00> : vector<4x16xf32>
    %75 = tpu.matmul %74, %69, %cst_59 {dimension_numbers = #tpu.dot_dimension_numbers<[1], [0], [0], [1], [0, 0, 1, 1], [], []>} : vector<4x8xf32>, vector<8x16xf32>, vector<4x16xf32> -> vector<4x16xf32>
    %c2_60 = arith.constant 2 : index
    %c0_61 = arith.constant 0 : index
    %c0_62 = arith.constant 0 : index
    %76 = vector.load %arg4[%c2_60, %c0_61, %c0_62] : memref<3x4x8xf32, #tpu.memory_space<vmem>>, vector<1x4x8xf32>
    %77 = vector.shape_cast %76 : vector<1x4x8xf32> to vector<4x8xf32>
    %cst_63 = arith.constant dense<0.000000e+00> : vector<4x16xf32>
    %78 = tpu.matmul %77, %69, %cst_63 {dimension_numbers = #tpu.dot_dimension_numbers<[1], [0], [0], [1], [0, 0, 1, 1], [], []>} : vector<4x8xf32>, vector<8x16xf32>, vector<4x16xf32> -> vector<4x16xf32>
    %cst_64 = arith.constant dense<0.000000e+00> : vector<4x16xf32>
    %79 = tpu.matmul %72, %6, %cst_64 {dimension_numbers = #tpu.dot_dimension_numbers<[1], [0], [0], [1], [0, 0, 1, 1], [], []>} : vector<4x16xf32>, vector<16x16xf32>, vector<4x16xf32> -> vector<4x16xf32>
    %80 = arith.addf %75, %79 : vector<4x16xf32>
    %cst_65 = arith.constant dense<0.000000e+00> : vector<4x16xf32>
    %81 = tpu.matmul %78, %13, %cst_65 {dimension_numbers = #tpu.dot_dimension_numbers<[1], [0], [0], [1], [0, 0, 1, 1], [], []>} : vector<4x16xf32>, vector<16x16xf32>, vector<4x16xf32> -> vector<4x16xf32>
    %82 = arith.addf %80, %81 : vector<4x16xf32>
    %c0_66 = arith.constant 0 : index
    %c0_67 = arith.constant 0 : index
    %83 = vector.load %arg5[%c0_66, %c0_67] : memref<4x1xf32, #tpu.memory_space<vmem>>, vector<4x1xf32>
    %84 = vector.broadcast %83 : vector<4x1xf32> to vector<4x16xf32>
    %85 = arith.addf %82, %84 : vector<4x16xf32>
    %c0_68 = arith.constant 0 : index
    %c0_69 = arith.constant 0 : index
    %86 = vector.load %arg10[%c0_68, %c0_69] : memref<16x32xf32, #tpu.memory_space<vmem>>, vector<16x32xf32>
    %cst_70 = arith.constant dense<0.000000e+00> : vector<4x32xf32>
    %87 = tpu.matmul %49, %86, %cst_70 {dimension_numbers = #tpu.dot_dimension_numbers<[1], [0], [0], [1], [0, 0, 1, 1], [], []>} : vector<4x16xf32>, vector<16x32xf32>, vector<4x32xf32> -> vector<4x32xf32>
    %c0_71 = arith.constant 0 : index
    %c0_72 = arith.constant 0 : index
    %88 = vector.load %arg11[%c0_71, %c0_72] : memref<1x32xf32, #tpu.memory_space<vmem>>, vector<1x32xf32>
    %89 = vector.broadcast %88 : vector<1x32xf32> to vector<4x32xf32>
    %90 = arith.addf %87, %89 : vector<4x32xf32>
    %cst_73 = arith.constant 0.000000e+00 : f32
    %91 = vector.broadcast %cst_73 : f32 to vector<4x32xf32>
    %92 = arith.maximumf %90, %91 : vector<4x32xf32>
    %cst_74 = arith.constant dense<0.000000e+00> : vector<32xf32>
    %93 = vector.multi_reduction <add>, %92, %cst_74 [0] : vector<4x32xf32> to vector<32xf32>
    %94 = vector.shape_cast %93 : vector<32xf32> to vector<1x32xf32>
    %c0_75 = arith.constant 0 : index
    %c0_76 = arith.constant 0 : index
    %95 = vector.load %arg10[%c0_75, %c0_76] : memref<16x32xf32, #tpu.memory_space<vmem>>, vector<16x32xf32>
    %cst_77 = arith.constant dense<0.000000e+00> : vector<4x32xf32>
    %96 = tpu.matmul %85, %95, %cst_77 {dimension_numbers = #tpu.dot_dimension_numbers<[1], [0], [0], [1], [0, 0, 1, 1], [], []>} : vector<4x16xf32>, vector<16x32xf32>, vector<4x32xf32> -> vector<4x32xf32>
    %c0_78 = arith.constant 0 : index
    %c0_79 = arith.constant 0 : index
    %97 = vector.load %arg11[%c0_78, %c0_79] : memref<1x32xf32, #tpu.memory_space<vmem>>, vector<1x32xf32>
    %98 = vector.broadcast %97 : vector<1x32xf32> to vector<4x32xf32>
    %99 = arith.addf %96, %98 : vector<4x32xf32>
    %cst_80 = arith.constant 0.000000e+00 : f32
    %100 = vector.broadcast %cst_80 : f32 to vector<4x32xf32>
    %101 = arith.maximumf %99, %100 : vector<4x32xf32>
    %cst_81 = arith.constant dense<0.000000e+00> : vector<32xf32>
    %102 = vector.multi_reduction <add>, %101, %cst_81 [0] : vector<4x32xf32> to vector<32xf32>
    %103 = vector.shape_cast %102 : vector<32xf32> to vector<1x32xf32>
    %104 = arith.addf %94, %103 : vector<1x32xf32>
    %cst_82 = arith.constant 1.250000e-01 : f32
    %105 = vector.broadcast %cst_82 : f32 to vector<1x32xf32>
    %106 = arith.mulf %104, %105 : vector<1x32xf32>
    %c0_83 = arith.constant 0 : index
    %c0_84 = arith.constant 0 : index
    %107 = vector.load %arg14[%c0_83, %c0_84] : memref<1x32xf32, #tpu.memory_space<vmem>>, vector<1x32xf32>
    %cst_85 = arith.constant 8.100000e-01 : f32
    %108 = vector.broadcast %cst_85 : f32 to vector<1x32xf32>
    %109 = arith.mulf %108, %107 : vector<1x32xf32>
    %cst_86 = arith.constant 1.900000e-01 : f32
    %110 = vector.broadcast %cst_86 : f32 to vector<1x32xf32>
    %111 = arith.mulf %110, %106 : vector<1x32xf32>
    %112 = arith.addf %109, %111 : vector<1x32xf32>
    %c0_87 = arith.constant 0 : index
    %c0_88 = arith.constant 0 : index
    %113 = vector.load %arg17[%c0_87, %c0_88] : memref<1x32xf32, #tpu.memory_space<vmem>>, vector<1x32xf32>
    tpu.vector_store %arg17[%c0_87, %c0_88], %112 {strides = array<i32>} : memref<1x32xf32, #tpu.memory_space<vmem>>, vector<1x32xf32>,
    %114 = arith.negf %112 : vector<1x32xf32>
    %115 = math.exp %114 : vector<1x32xf32>
    %cst_89 = arith.constant 1.000000e+00 : f32
    %116 = vector.broadcast %cst_89 : f32 to vector<1x32xf32>
    %117 = arith.addf %116, %115 : vector<1x32xf32>
    %118 = arith.divf %116, %117 : vector<1x32xf32>
    %cst_90 = arith.constant 9.99999997E-7 : f32
    %cst_91 = arith.constant 0.999998986 : f32
    %119 = vector.broadcast %cst_90 : f32 to vector<1x32xf32>
    %120 = arith.maximumf %119, %118 : vector<1x32xf32>
    %121 = vector.broadcast %cst_91 : f32 to vector<1x32xf32>
    %122 = arith.minimumf %121, %120 : vector<1x32xf32>
    %cst_92 = arith.constant 5.000000e-02 : f32
    %123 = vector.broadcast %cst_92 : f32 to vector<1x32xf32>
    %124 = arith.divf %122, %123 : vector<1x32xf32>
    %125 = math.log %124 : vector<1x32xf32>
    %126 = arith.mulf %122, %125 : vector<1x32xf32>
    %cst_93 = arith.constant 1.000000e+00 : f32
    %127 = vector.broadcast %cst_93 : f32 to vector<1x32xf32>
    %128 = arith.subf %127, %122 : vector<1x32xf32>
    %cst_94 = arith.constant 1.000000e+00 : f32
    %129 = vector.broadcast %cst_94 : f32 to vector<1x32xf32>
    %130 = arith.subf %129, %122 : vector<1x32xf32>
    %cst_95 = arith.constant 0.949999988 : f32
    %131 = vector.broadcast %cst_95 : f32 to vector<1x32xf32>
    %132 = arith.divf %130, %131 : vector<1x32xf32>
    %133 = math.log %132 : vector<1x32xf32>
    %134 = arith.mulf %128, %133 : vector<1x32xf32>
    %135 = arith.addf %126, %134 : vector<1x32xf32>
    %136 = vector.shape_cast %135 : vector<1x32xf32> to vector<1x1x32xf32>
    %cst_96 = arith.constant dense<0.000000e+00> : vector<1xf32>
    %137 = vector.multi_reduction <add>, %136, %cst_96 [1, 2] : vector<1x1x32xf32> to vector<1xf32>
    %138 = vector.shape_cast %137 : vector<1xf32> to vector<1x1x1xf32>
    %139 = vector.extract %138[0, 0, 0] : f32 from vector<1x1x1xf32>
    %140 = vector.broadcast %139 : f32 to vector<1x1xf32>
    %c0_97 = arith.constant 0 : index
    %c0_98 = arith.constant 0 : index
    %141 = vector.load %arg16[%c0_97, %c0_98] : memref<1x1xf32, #tpu.memory_space<vmem>>, vector<1x1xf32>
    tpu.vector_store %arg16[%c0_97, %c0_98], %140 {strides = array<i32>} : memref<1x1xf32, #tpu.memory_space<vmem>>, vector<1x1xf32>,
    %c0_99 = arith.constant 0 : index
    %c0_100 = arith.constant 0 : index
    %142 = vector.load %arg12[%c0_99, %c0_100] : memref<32x16xf32, #tpu.memory_space<vmem>>, vector<32x16xf32>
    %cst_101 = arith.constant dense<0.000000e+00> : vector<4x16xf32>
    %143 = tpu.matmul %92, %142, %cst_101 {dimension_numbers = #tpu.dot_dimension_numbers<[1], [0], [0], [1], [0, 0, 1, 1], [], []>} : vector<4x32xf32>, vector<32x16xf32>, vector<4x16xf32> -> vector<4x16xf32>
    %c0_102 = arith.constant 0 : index
    %c0_103 = arith.constant 0 : index
    %144 = vector.load %arg13[%c0_102, %c0_103] : memref<1x16xf32, #tpu.memory_space<vmem>>, vector<1x16xf32>
    %145 = vector.broadcast %144 : vector<1x16xf32> to vector<4x16xf32>
    %146 = arith.addf %143, %145 : vector<4x16xf32>
    %c0_104 = arith.constant 0 : index
    %c0_105 = arith.constant 0 : index
    %147 = vector.load %arg12[%c0_104, %c0_105] : memref<32x16xf32, #tpu.memory_space<vmem>>, vector<32x16xf32>
    %cst_106 = arith.constant dense<0.000000e+00> : vector<4x16xf32>
    %148 = tpu.matmul %101, %147, %cst_106 {dimension_numbers = #tpu.dot_dimension_numbers<[1], [0], [0], [1], [0, 0, 1, 1], [], []>} : vector<4x32xf32>, vector<32x16xf32>, vector<4x16xf32> -> vector<4x16xf32>
    %c0_107 = arith.constant 0 : index
    %c0_108 = arith.constant 0 : index
    %149 = vector.load %arg13[%c0_107, %c0_108] : memref<1x16xf32, #tpu.memory_space<vmem>>, vector<1x16xf32>
    %150 = vector.broadcast %149 : vector<1x16xf32> to vector<4x16xf32>
    %151 = arith.addf %148, %150 : vector<4x16xf32>
    %c0_109 = arith.constant 0 : index
    %c0_110 = arith.constant 0 : index
    %c0_111 = arith.constant 0 : index
    %152 = vector.load %arg6[%c0_109, %c0_110, %c0_111] : memref<3x8x4xf32, #tpu.memory_space<vmem>>, vector<1x8x4xf32>
    %153 = vector.shape_cast %152 : vector<1x8x4xf32> to vector<8x4xf32>
    %cst_112 = arith.constant dense<0.000000e+00> : vector<8x16xf32>
    %154 = tpu.matmul %153, %146, %cst_112 {dimension_numbers = #tpu.dot_dimension_numbers<[1], [0], [0], [1], [0, 0, 1, 1], [], []>} : vector<8x4xf32>, vector<4x16xf32>, vector<8x16xf32> -> vector<8x16xf32>
    %c1_113 = arith.constant 1 : index
    %c0_114 = arith.constant 0 : index
    %c0_115 = arith.constant 0 : index
    %155 = vector.load %arg6[%c1_113, %c0_114, %c0_115] : memref<3x8x4xf32, #tpu.memory_space<vmem>>, vector<1x8x4xf32>
    %156 = vector.shape_cast %155 : vector<1x8x4xf32> to vector<8x4xf32>
    %cst_116 = arith.constant dense<0.000000e+00> : vector<8x16xf32>
    %157 = tpu.matmul %156, %146, %cst_116 {dimension_numbers = #tpu.dot_dimension_numbers<[1], [0], [0], [1], [0, 0, 1, 1], [], []>} : vector<8x4xf32>, vector<4x16xf32>, vector<8x16xf32> -> vector<8x16xf32>
    %c2_117 = arith.constant 2 : index
    %c0_118 = arith.constant 0 : index
    %c0_119 = arith.constant 0 : index
    %158 = vector.load %arg6[%c2_117, %c0_118, %c0_119] : memref<3x8x4xf32, #tpu.memory_space<vmem>>, vector<1x8x4xf32>
    %159 = vector.shape_cast %158 : vector<1x8x4xf32> to vector<8x4xf32>
    %cst_120 = arith.constant dense<0.000000e+00> : vector<8x16xf32>
    %160 = tpu.matmul %159, %146, %cst_120 {dimension_numbers = #tpu.dot_dimension_numbers<[1], [0], [0], [1], [0, 0, 1, 1], [], []>} : vector<8x4xf32>, vector<4x16xf32>, vector<8x16xf32> -> vector<8x16xf32>
    %cst_121 = arith.constant dense<0.000000e+00> : vector<8x16xf32>
    %161 = tpu.matmul %154, %6, %cst_121 {dimension_numbers = #tpu.dot_dimension_numbers<[1], [0], [0], [1], [0, 0, 1, 1], [], []>} : vector<8x16xf32>, vector<16x16xf32>, vector<8x16xf32> -> vector<8x16xf32>
    %162 = arith.addf %157, %161 : vector<8x16xf32>
    %cst_122 = arith.constant dense<0.000000e+00> : vector<8x16xf32>
    %163 = tpu.matmul %160, %13, %cst_122 {dimension_numbers = #tpu.dot_dimension_numbers<[1], [0], [0], [1], [0, 0, 1, 1], [], []>} : vector<8x16xf32>, vector<16x16xf32>, vector<8x16xf32> -> vector<8x16xf32>
    %164 = arith.addf %162, %163 : vector<8x16xf32>
    %c0_123 = arith.constant 0 : index
    %c0_124 = arith.constant 0 : index
    %165 = vector.load %arg7[%c0_123, %c0_124] : memref<8x1xf32, #tpu.memory_space<vmem>>, vector<8x1xf32>
    %166 = vector.broadcast %165 : vector<8x1xf32> to vector<8x16xf32>
    %167 = arith.addf %164, %166 : vector<8x16xf32>
    %cst_125 = arith.constant 0.000000e+00 : f32
    %168 = vector.broadcast %cst_125 : f32 to vector<8x16xf32>
    %169 = arith.maximumf %167, %168 : vector<8x16xf32>
    %170 = arith.addf %169, %33 : vector<8x16xf32>
    %c0_126 = arith.constant 0 : index
    %c0_127 = arith.constant 0 : index
    %c0_128 = arith.constant 0 : index
    %171 = vector.load %arg8[%c0_126, %c0_127, %c0_128] : memref<3x4x8xf32, #tpu.memory_space<vmem>>, vector<1x4x8xf32>
    %172 = vector.shape_cast %171 : vector<1x4x8xf32> to vector<4x8xf32>
    %cst_129 = arith.constant dense<0.000000e+00> : vector<4x16xf32>
    %173 = tpu.matmul %172, %170, %cst_129 {dimension_numbers = #tpu.dot_dimension_numbers<[1], [0], [0], [1], [0, 0, 1, 1], [], []>} : vector<4x8xf32>, vector<8x16xf32>, vector<4x16xf32> -> vector<4x16xf32>
    %c1_130 = arith.constant 1 : index
    %c0_131 = arith.constant 0 : index
    %c0_132 = arith.constant 0 : index
    %174 = vector.load %arg8[%c1_130, %c0_131, %c0_132] : memref<3x4x8xf32, #tpu.memory_space<vmem>>, vector<1x4x8xf32>
    %175 = vector.shape_cast %174 : vector<1x4x8xf32> to vector<4x8xf32>
    %cst_133 = arith.constant dense<0.000000e+00> : vector<4x16xf32>
    %176 = tpu.matmul %175, %170, %cst_133 {dimension_numbers = #tpu.dot_dimension_numbers<[1], [0], [0], [1], [0, 0, 1, 1], [], []>} : vector<4x8xf32>, vector<8x16xf32>, vector<4x16xf32> -> vector<4x16xf32>
    %c2_134 = arith.constant 2 : index
    %c0_135 = arith.constant 0 : index
    %c0_136 = arith.constant 0 : index
    %177 = vector.load %arg8[%c2_134, %c0_135, %c0_136] : memref<3x4x8xf32, #tpu.memory_space<vmem>>, vector<1x4x8xf32>
    %178 = vector.shape_cast %177 : vector<1x4x8xf32> to vector<4x8xf32>
    %cst_137 = arith.constant dense<0.000000e+00> : vector<4x16xf32>
    %179 = tpu.matmul %178, %170, %cst_137 {dimension_numbers = #tpu.dot_dimension_numbers<[1], [0], [0], [1], [0, 0, 1, 1], [], []>} : vector<4x8xf32>, vector<8x16xf32>, vector<4x16xf32> -> vector<4x16xf32>
    %cst_138 = arith.constant dense<0.000000e+00> : vector<4x16xf32>
    %180 = tpu.matmul %173, %6, %cst_138 {dimension_numbers = #tpu.dot_dimension_numbers<[1], [0], [0], [1], [0, 0, 1, 1], [], []>} : vector<4x16xf32>, vector<16x16xf32>, vector<4x16xf32> -> vector<4x16xf32>
    %181 = arith.addf %176, %180 : vector<4x16xf32>
    %cst_139 = arith.constant dense<0.000000e+00> : vector<4x16xf32>
    %182 = tpu.matmul %179, %13, %cst_139 {dimension_numbers = #tpu.dot_dimension_numbers<[1], [0], [0], [1], [0, 0, 1, 1], [], []>} : vector<4x16xf32>, vector<16x16xf32>, vector<4x16xf32> -> vector<4x16xf32>
    %183 = arith.addf %181, %182 : vector<4x16xf32>
    %c0_140 = arith.constant 0 : index
    %c0_141 = arith.constant 0 : index
    %184 = vector.load %arg9[%c0_140, %c0_141] : memref<4x1xf32, #tpu.memory_space<vmem>>, vector<4x1xf32>
    %185 = vector.broadcast %184 : vector<4x1xf32> to vector<4x16xf32>
    %186 = arith.addf %183, %185 : vector<4x16xf32>
    %c0_142 = arith.constant 0 : index
    %c0_143 = arith.constant 0 : index
    %c0_144 = arith.constant 0 : index
    %187 = vector.load %arg15[%c0_142, %c0_143, %c0_144] : memref<2x4x16xf32, #tpu.memory_space<vmem>>, vector<1x4x16xf32>
    %188 = vector.shape_cast %187 : vector<1x4x16xf32> to vector<4x16xf32>
    %189 = vector.shape_cast %186 : vector<4x16xf32> to vector<1x4x16xf32>
    tpu.vector_store %arg15[%c0_142, %c0_143, %c0_144], %189 {strides = array<i32>} : memref<2x4x16xf32, #tpu.memory_space<vmem>>, vector<1x4x16xf32>,
    %c0_145 = arith.constant 0 : index
    %c0_146 = arith.constant 0 : index
    %c0_147 = arith.constant 0 : index
    %190 = vector.load %arg6[%c0_145, %c0_146, %c0_147] : memref<3x8x4xf32, #tpu.memory_space<vmem>>, vector<1x8x4xf32>
    %191 = vector.shape_cast %190 : vector<1x8x4xf32> to vector<8x4xf32>
    %cst_148 = arith.constant dense<0.000000e+00> : vector<8x16xf32>
    %192 = tpu.matmul %191, %151, %cst_148 {dimension_numbers = #tpu.dot_dimension_numbers<[1], [0], [0], [1], [0, 0, 1, 1], [], []>} : vector<8x4xf32>, vector<4x16xf32>, vector<8x16xf32> -> vector<8x16xf32>
    %c1_149 = arith.constant 1 : index
    %c0_150 = arith.constant 0 : index
    %c0_151 = arith.constant 0 : index
    %193 = vector.load %arg6[%c1_149, %c0_150, %c0_151] : memref<3x8x4xf32, #tpu.memory_space<vmem>>, vector<1x8x4xf32>
    %194 = vector.shape_cast %193 : vector<1x8x4xf32> to vector<8x4xf32>
    %cst_152 = arith.constant dense<0.000000e+00> : vector<8x16xf32>
    %195 = tpu.matmul %194, %151, %cst_152 {dimension_numbers = #tpu.dot_dimension_numbers<[1], [0], [0], [1], [0, 0, 1, 1], [], []>} : vector<8x4xf32>, vector<4x16xf32>, vector<8x16xf32> -> vector<8x16xf32>
    %c2_153 = arith.constant 2 : index
    %c0_154 = arith.constant 0 : index
    %c0_155 = arith.constant 0 : index
    %196 = vector.load %arg6[%c2_153, %c0_154, %c0_155] : memref<3x8x4xf32, #tpu.memory_space<vmem>>, vector<1x8x4xf32>
    %197 = vector.shape_cast %196 : vector<1x8x4xf32> to vector<8x4xf32>
    %cst_156 = arith.constant dense<0.000000e+00> : vector<8x16xf32>
    %198 = tpu.matmul %197, %151, %cst_156 {dimension_numbers = #tpu.dot_dimension_numbers<[1], [0], [0], [1], [0, 0, 1, 1], [], []>} : vector<8x4xf32>, vector<4x16xf32>, vector<8x16xf32> -> vector<8x16xf32>
    %cst_157 = arith.constant dense<0.000000e+00> : vector<8x16xf32>
    %199 = tpu.matmul %192, %6, %cst_157 {dimension_numbers = #tpu.dot_dimension_numbers<[1], [0], [0], [1], [0, 0, 1, 1], [], []>} : vector<8x16xf32>, vector<16x16xf32>, vector<8x16xf32> -> vector<8x16xf32>
    %200 = arith.addf %195, %199 : vector<8x16xf32>
    %cst_158 = arith.constant dense<0.000000e+00> : vector<8x16xf32>
    %201 = tpu.matmul %198, %13, %cst_158 {dimension_numbers = #tpu.dot_dimension_numbers<[1], [0], [0], [1], [0, 0, 1, 1], [], []>} : vector<8x16xf32>, vector<16x16xf32>, vector<8x16xf32> -> vector<8x16xf32>
    %202 = arith.addf %200, %201 : vector<8x16xf32>
    %c0_159 = arith.constant 0 : index
    %c0_160 = arith.constant 0 : index
    %203 = vector.load %arg7[%c0_159, %c0_160] : memref<8x1xf32, #tpu.memory_space<vmem>>, vector<8x1xf32>
    %204 = vector.broadcast %203 : vector<8x1xf32> to vector<8x16xf32>
    %205 = arith.addf %202, %204 : vector<8x16xf32>
    %cst_161 = arith.constant 0.000000e+00 : f32
    %206 = vector.broadcast %cst_161 : f32 to vector<8x16xf32>
    %207 = arith.maximumf %205, %206 : vector<8x16xf32>
    %208 = arith.addf %207, %69 : vector<8x16xf32>
    %c0_162 = arith.constant 0 : index
    %c0_163 = arith.constant 0 : index
    %c0_164 = arith.constant 0 : index
    %209 = vector.load %arg8[%c0_162, %c0_163, %c0_164] : memref<3x4x8xf32, #tpu.memory_space<vmem>>, vector<1x4x8xf32>
    %210 = vector.shape_cast %209 : vector<1x4x8xf32> to vector<4x8xf32>
    %cst_165 = arith.constant dense<0.000000e+00> : vector<4x16xf32>
    %211 = tpu.matmul %210, %208, %cst_165 {dimension_numbers = #tpu.dot_dimension_numbers<[1], [0], [0], [1], [0, 0, 1, 1], [], []>} : vector<4x8xf32>, vector<8x16xf32>, vector<4x16xf32> -> vector<4x16xf32>
    %c1_166 = arith.constant 1 : index
    %c0_167 = arith.constant 0 : index
    %c0_168 = arith.constant 0 : index
    %212 = vector.load %arg8[%c1_166, %c0_167, %c0_168] : memref<3x4x8xf32, #tpu.memory_space<vmem>>, vector<1x4x8xf32>
    %213 = vector.shape_cast %212 : vector<1x4x8xf32> to vector<4x8xf32>
    %cst_169 = arith.constant dense<0.000000e+00> : vector<4x16xf32>
    %214 = tpu.matmul %213, %208, %cst_169 {dimension_numbers = #tpu.dot_dimension_numbers<[1], [0], [0], [1], [0, 0, 1, 1], [], []>} : vector<4x8xf32>, vector<8x16xf32>, vector<4x16xf32> -> vector<4x16xf32>
    %c2_170 = arith.constant 2 : index
    %c0_171 = arith.constant 0 : index
    %c0_172 = arith.constant 0 : index
    %215 = vector.load %arg8[%c2_170, %c0_171, %c0_172] : memref<3x4x8xf32, #tpu.memory_space<vmem>>, vector<1x4x8xf32>
    %216 = vector.shape_cast %215 : vector<1x4x8xf32> to vector<4x8xf32>
    %cst_173 = arith.constant dense<0.000000e+00> : vector<4x16xf32>
    %217 = tpu.matmul %216, %208, %cst_173 {dimension_numbers = #tpu.dot_dimension_numbers<[1], [0], [0], [1], [0, 0, 1, 1], [], []>} : vector<4x8xf32>, vector<8x16xf32>, vector<4x16xf32> -> vector<4x16xf32>
    %cst_174 = arith.constant dense<0.000000e+00> : vector<4x16xf32>
    %218 = tpu.matmul %211, %6, %cst_174 {dimension_numbers = #tpu.dot_dimension_numbers<[1], [0], [0], [1], [0, 0, 1, 1], [], []>} : vector<4x16xf32>, vector<16x16xf32>, vector<4x16xf32> -> vector<4x16xf32>
    %219 = arith.addf %214, %218 : vector<4x16xf32>
    %cst_175 = arith.constant dense<0.000000e+00> : vector<4x16xf32>
    %220 = tpu.matmul %217, %13, %cst_175 {dimension_numbers = #tpu.dot_dimension_numbers<[1], [0], [0], [1], [0, 0, 1, 1], [], []>} : vector<4x16xf32>, vector<16x16xf32>, vector<4x16xf32> -> vector<4x16xf32>
    %221 = arith.addf %219, %220 : vector<4x16xf32>
    %c0_176 = arith.constant 0 : index
    %c0_177 = arith.constant 0 : index
    %222 = vector.load %arg9[%c0_176, %c0_177] : memref<4x1xf32, #tpu.memory_space<vmem>>, vector<4x1xf32>
    %223 = vector.broadcast %222 : vector<4x1xf32> to vector<4x16xf32>
    %224 = arith.addf %221, %223 : vector<4x16xf32>
    %c1_178 = arith.constant 1 : index
    %c0_179 = arith.constant 0 : index
    %c0_180 = arith.constant 0 : index
    %225 = vector.load %arg15[%c1_178, %c0_179, %c0_180] : memref<2x4x16xf32, #tpu.memory_space<vmem>>, vector<1x4x16xf32>
    %226 = vector.shape_cast %225 : vector<1x4x16xf32> to vector<4x16xf32>
    %227 = vector.shape_cast %224 : vector<4x16xf32> to vector<1x4x16xf32>
    tpu.vector_store %arg15[%c1_178, %c0_179, %c0_180], %227 {strides = array<i32>} : memref<2x4x16xf32, #tpu.memory_space<vmem>>, vector<1x4x16xf32>,
    return
  }
  func.func @transform_0(%arg0: i32) -> (i32, i32, i32) {
    %c0_i32 = arith.constant 0 : i32
    %c0_i32_0 = arith.constant 0 : i32
    %c0_i32_1 = arith.constant 0 : i32
    %c0_i32_2 = arith.constant 0 : i32
    return %c0_i32, %c0_i32_0, %c0_i32_1 : i32, i32, i32
  }
  func.func @transform_1(%arg0: i32) -> (i32, i32, i32) {
    %c0_i32 = arith.constant 0 : i32
    %c0_i32_0 = arith.constant 0 : i32
    %c0_i32_1 = arith.constant 0 : i32
    %c0_i32_2 = arith.constant 0 : i32
    return %c0_i32, %c0_i32_0, %c0_i32_1 : i32, i32, i32
  }
  func.func @transform_2(%arg0: i32) -> (i32, i32) {
    %c0_i32 = arith.constant 0 : i32
    %c0_i32_0 = arith.constant 0 : i32
    %c0_i32_1 = arith.constant 0 : i32
    return %c0_i32, %c0_i32_0 : i32, i32
  }
  func.func @transform_3(%arg0: i32) -> (i32, i32, i32) {
    %c0_i32 = arith.constant 0 : i32
    %c0_i32_0 = arith.constant 0 : i32
    %c0_i32_1 = arith.constant 0 : i32
    %c0_i32_2 = arith.constant 0 : i32
    return %c0_i32, %c0_i32_0, %c0_i32_1 : i32, i32, i32
  }
  func.func @transform_4(%arg0: i32) -> (i32, i32) {
    %c0_i32 = arith.constant 0 : i32
    %c0_i32_0 = arith.constant 0 : i32
    %c0_i32_1 = arith.constant 0 : i32
    return %c0_i32, %c0_i32_0 : i32, i32
  }
  func.func @transform_5(%arg0: i32) -> (i32, i32, i32) {
    %c0_i32 = arith.constant 0 : i32
    %c0_i32_0 = arith.constant 0 : i32
    %c0_i32_1 = arith.constant 0 : i32
    %c0_i32_2 = arith.constant 0 : i32
    return %c0_i32, %c0_i32_0, %c0_i32_1 : i32, i32, i32
  }
  func.func @transform_6(%arg0: i32) -> (i32, i32) {
    %c0_i32 = arith.constant 0 : i32
    %c0_i32_0 = arith.constant 0 : i32
    %c0_i32_1 = arith.constant 0 : i32
    return %c0_i32, %c0_i32_0 : i32, i32
  }
  func.func @transform_7(%arg0: i32) -> (i32, i32, i32) {
    %c0_i32 = arith.constant 0 : i32
    %c0_i32_0 = arith.constant 0 : i32
    %c0_i32_1 = arith.constant 0 : i32
    %c0_i32_2 = arith.constant 0 : i32
    return %c0_i32, %c0_i32_0, %c0_i32_1 : i32, i32, i32
  }
  func.func @transform_8(%arg0: i32) -> (i32, i32) {
    %c0_i32 = arith.constant 0 : i32
    %c0_i32_0 = arith.constant 0 : i32
    %c0_i32_1 = arith.constant 0 : i32
    return %c0_i32, %c0_i32_0 : i32, i32
  }
  func.func @transform_9(%arg0: i32) -> (i32, i32) {
    %c0_i32 = arith.constant 0 : i32
    %c0_i32_0 = arith.constant 0 : i32
    %c0_i32_1 = arith.constant 0 : i32
    return %c0_i32, %c0_i32_0 : i32, i32
  }
  func.func @transform_10(%arg0: i32) -> (i32, i32) {
    %c0_i32 = arith.constant 0 : i32
    %c0_i32_0 = arith.constant 0 : i32
    %c0_i32_1 = arith.constant 0 : i32
    return %c0_i32, %c0_i32_0 : i32, i32
  }
  func.func @transform_11(%arg0: i32) -> (i32, i32) {
    %c0_i32 = arith.constant 0 : i32
    %c0_i32_0 = arith.constant 0 : i32
    %c0_i32_1 = arith.constant 0 : i32
    return %c0_i32, %c0_i32_0 : i32, i32
  }
  func.func @transform_12(%arg0: i32) -> (i32, i32) {
    %c0_i32 = arith.constant 0 : i32
    %c0_i32_0 = arith.constant 0 : i32
    %c0_i32_1 = arith.constant 0 : i32
    return %c0_i32, %c0_i32_0 : i32, i32
  }
  func.func @transform_13(%arg0: i32) -> (i32, i32) {
    %c0_i32 = arith.constant 0 : i32
    %c0_i32_0 = arith.constant 0 : i32
    %c0_i32_1 = arith.constant 0 : i32
    return %c0_i32, %c0_i32_0 : i32, i32
  }
  func.func @transform_14(%arg0: i32) -> (i32, i32, i32) {
    %c0_i32 = arith.constant 0 : i32
    %c0_i32_0 = arith.constant 0 : i32
    %c0_i32_1 = arith.constant 0 : i32
    %c0_i32_2 = arith.constant 0 : i32
    return %c0_i32, %c0_i32_0, %c0_i32_1 : i32, i32, i32
  }
  func.func @transform_15(%arg0: i32) -> (i32, i32) {
    %c0_i32 = arith.constant 0 : i32
    %c0_i32_0 = arith.constant 0 : i32
    %c0_i32_1 = arith.constant 0 : i32
    return %c0_i32, %c0_i32_0 : i32, i32
  }
  func.func @transform_16(%arg0: i32) -> (i32, i32) {
    %c0_i32 = arith.constant 0 : i32
    %c0_i32_0 = arith.constant 0 : i32
    %c0_i32_1 = arith.constant 0 : i32
    return %c0_i32, %c0_i32_0 : i32, i32
  }
}

</mosaic_0001>

<bundles_post_ra>
// kernel: tpu_custom_call.1
= control target key start
LH: loop header
LB: loop body
LE: loop exit
PB: predicated region body
PF: predicated region fallthrough
CT: control target
= control target key end

     0   :  { %s1933_s0 = inlined_call_operand.vmem [shape: f32[2,4,16], index: 0, kind: input, shape index: {}]   ;;  %s1934_s1 = inlined_call_operand.vmem [shape: f32[3,8,4], index: 1, kind: input, shape index: {}]   ;;  %s1935_s2 = inlined_call_operand.vmem [shape: f32[8,1], index: 2, kind: input, shape index: {}]   ;;  %s1936_s3 = inlined_call_operand.vmem [shape: f32[3,4,8], index: 3, kind: input, shape index: {}]   ;;  %s1937_s4 = inlined_call_operand.vmem [shape: f32[4,1], index: 4, kind: input, shape index: {}]   ;;  %s1938_s5 = inlined_call_operand.vmem [shape: f32[3,8,4], index: 5, kind: input, shape index: {}]   ;;  %s1939_s6 = inlined_call_operand.vmem [shape: f32[8,1], index: 6, kind: input, shape index: {}]   ;;  %s1940_s7 = inlined_call_operand.vmem [shape: f32[3,4,8], index: 7, kind: input, shape index: {}]   ;;  %s1941_s8 = inlined_call_operand.vmem [shape: f32[4,1], index: 8, kind: input, shape index: {}]   ;;  %s1942_s9 = inlined_call_operand.vmem [shape: f32[16,32], index: 9, kind: input, shape index: {}]   ;;  %s1943_s10 = inlined_call_operand.vmem [shape: f32[1,32], index: 10, kind: input, shape index: {}]   ;;  %s1944_s11 = inlined_call_operand.vmem [shape: f32[32,16], index: 11, kind: input, shape index: {}]   ;;  %s1945_s12 = inlined_call_operand.vmem [shape: f32[1,16], index: 12, kind: input, shape index: {}]   ;;  %s1946_s13 = inlined_call_operand.vmem [shape: f32[1,32], index: 13, kind: input, shape index: {}]   ;;  %s1947_s14 = inlined_call_operand.hbm [shape: f32[2,4,16], index: 14, kind: output, shape index: {0}]   ;;  %s1948_s15 = inlined_call_operand.hbm [shape: f32[1,1], index: 15, kind: output, shape index: {1}]   ;;  %s1949_s16 = inlined_call_operand.hbm [shape: f32[1,32], index: 16, kind: output, shape index: {2}]  }
   0x1   :  { %1951 = sst [smem:[#allocation9_spill]] %s1933_s0 }
   0x2   :  { %22 = vsyncpa [#allocation3], 0  ;;  %s1952_s23 = sld [smem:[#allocation9_spill]]  ;;  %vm77_vm0 = vcmask 1043456   ;;  %v1629_v1 = vld [vmem:[%s1934_s1] sm:$0xff]  ;;  %vm73_vm1 = vcmask 31744   ;;  %v52_v3 = vlaneseq }
   0x3   :  { %v1634_v2 = vld [vmem:[%s1934_s1 + $0x10] sm:$0xff] }
   0x4   :  { %v53_v4 = vshrl.u32 %v52_v3, 7  ;;  %v56_v5 = vand.u32 127, %v52_v3 }
   0x8   :  { %v71_v0 = vld [vmem:[%s1952_s23] sm:$0xf] }
   0x9   :  { %1323 = vmatpush.msk.msra.mxu0 %vm77_vm0, %v71_v0  ;;  %1327 = vmatpush.msk.msra.mxu1 %vm77_vm0, %v71_v0 }
   0xa   :  { %1324 = vmatmul.msk.f32.vlgmr.msra.gmra.mxu0 %vm73_vm1, %v1629_v1  ;;  %1328 = vmatmul.msk.f32.vlgmr.msra.gmra.mxu1 %vm73_vm1, %v1634_v2 }
   0xb   :  { %23 = vsyncpa [#allocation5], 0  ;;  %1332 = vmatpush.msk.msra.mxu3 %vm77_vm0, %v71_v0  ;;  %v54_v6 = vadd.s32 8, %v53_v4  ;;  %v57_v7 = vadd.s32 4294967295, %v56_v5  ;;  %v1529_v9 = vmov 1.0   ;;  %v1325_v11 = vld [vmem:[%s1934_s1 + $0x8] sm:$0xff] }
   0xc   :  { %1333 = vmatmul.msk.f32.vlgmr.msra.gmra.mxu3 %vm73_vm1, %v1325_v11  ;;  %v199_v12 = vld [vmem:[%s1935_s2] sm:$0xff]  ;;  %v64_v13 = vadd.s32 1, %v56_v5  ;;  %v1530_v14 = vmov 0   ;;  %vm128_vm6 = vcmask 130048   ;;  %vm208_vm7 = vcmask 64512   ;;  %v559_v38 = vld [vmem:[%s1942_s9 + $0x8] sm:$0xff] }
   0xd   :  { %vm1643_vm2 = vcmp.eq.s32.totalorder %v54_v6, %v57_v7  ;;  %vm1650_vm3 = vcmp.eq.s32.totalorder %v53_v4, %v57_v7  ;;  %1436 = vset.pattern.permute.xlu0 %v1530_v14  ;;  %1437 = vset.pattern.permute.xlu1 %v1530_v14  ;;  %v329_v17 = vld [vmem:[%s1937_s4] sm:$0xf]  ;;  %v1339_v30 = vld [vmem:[%s1936_s3 + $0x8] sm:$0xf]  ;;  %v1338_v31 = vld [vmem:[%s1936_s3 + $0x4] sm:$0xf] }
   0xe   :  { %1329 = vmatpush.msk.msra.mxu2 %vm1643_vm2, %v1529_v9  ;;  %202 = vperm.xlu0 %1436, %v199_v12   ;;  %vm1667_vm4 = vcmp.eq.s32.totalorder %v54_v6, %v64_v13  ;;  %vm1671_vm5 = vcmp.eq.s32.totalorder %v53_v4, %v64_v13  ;;  %v1261_v18 = vld [vmem:[%s1941_s8] sm:$0xf]  ;;  %v1348_v32 = vld [vmem:[%s1952_s23 + $0x4] sm:$0xf]  ;;  %v696_v53 = vld [vmem:[%s1944_s11 + $0x18] sm:$0xff]  ;;  %vm701_vm8 = vcmask 261120  }
   0xf   :  { %1334 = vmatpush.msk.msrb.mxu0 %vm1667_vm4, %v1529_v9  ;;  %1438 = vset.pattern.permute.xlu2 %v1530_v14  ;;  %v207_v29 = vld [vmem:[%s1936_s3] sm:$0xf]  ;;  %v695_v54 = vld [vmem:[%s1944_s11 + $0x10] sm:$0xff]  ;;  %v694_v55 = vld [vmem:[%s1944_s11 + $0x8] sm:$0xff]  ;;  %vm588_vm9 = vcmask 257024   ;;  %vm633_vm10 = vcmask 253952  }
  0x10   :  { %1330 = vmatpush.msk.msra.mxu2 %vm1650_vm3, %v1529_v9  ;;  %v558_v39 = vld [vmem:[%s1942_s9] sm:$0xff]  ;;  %v1808_v12 = vld [vmem:[%s1938_s5 + $0x10] sm:$0xff]  ;;  %s1290_s21 = sshll.u32 %s1948_s15, 4  ;;  %s1534_s22 = smov [#allocation6]   ;;  %s1291_s21 = int_to_ptr.hbm [resolvable:$true] %s1290_s21 }
  0x11   :  { %1335 = vmatpush.msk.msrb.mxu0 %vm1671_vm5, %v1529_v9  ;;  %v693_v56 = vld [vmem:[%s1944_s11] sm:$0xff]  ;;  %s1299_s24 = sshll.u32 %s1534_s22, 4  ;;  %s1535_s26 = smov [#allocation2]   ;;  %s1300_s24 = int_to_ptr.vmem [resolvable:$true] %s1299_s24 }
  0x12   :  { %1341 = vmatpush.msk.msrb.mxu2 %vm1643_vm2, %v1529_v9  ;;  %v1439_v59 = vld [vmem:[%s1943_s10] ss:$0 sm:$0xff]  ;;  %s1274_s3 = sshll.u32 %s1535_s26, 4  ;;  %s1275_s3 = int_to_ptr.vmem [resolvable:$true] %s1274_s3 }
  0x13   :  { %v1797_v5 = vld [vmem:[%s1945_s12] ss:$0 sm:$0xff] }
  0x14   :  { %1342 = vmatpush.msk.msrb.mxu2 %vm1650_vm3, %v1529_v9  ;;  %v872_v13 = vld [vmem:[%s1939_s6] sm:$0xff]  ;;  %s1301_s6 = sshll.u32 %s1949_s16, 4  ;;  %s1536_s16 = smov 64   ;;  %s1302_s6 = int_to_ptr.hbm [resolvable:$true] %s1301_s6 }
  0x15   :  { %875 = vperm.xlu1 %1437, %v872_v13  }
  0x16   :  { %332 = vperm.xlu0 %1436, %v329_v17  }
  0x1d   :  { %1136 = vperm.xlu1 %1437, %v872_v13  }
  0x1e   :  { %1264 = vperm.xlu0 %1436, %v1261_v18  }
  0x80   :  { %v203_v26 = vpop.permute.xlu0 %202 }
  0x87   :  { %v98_v19 = vpop.f32.mrf.mxu0  ;;  %v125_v20 = vpop.f32.mrf.mxu1 }
  0x88   :  { %1331 = vmatmul.msk.f32.vlgmr.msra.gmra.mxu2 %vm128_vm6, %v98_v19  ;;  %1336 = vmatmul.msk.f32.vlgmr.msrb.gmra.mxu0 %vm128_vm6, %v125_v20  ;;  %v333_v51 = vpop.permute.xlu0 %332 }
  0x89   :  { %1351 = vmatpush.msk.msra.mxu2 %vm77_vm0, %v1348_v32 }
  0x8f   :  { %v172_v21 = vpop.f32.mrf.mxu3 }
 0x105   :  { %v195_v23 = vpop.f32.mrf.mxu0 }
 0x10b   :  { %v149_v22 = vpop.f32.mrf.mxu2 }
 0x10c   :  { %v173_v24 = vadd.f32 %v172_v21, %v149_v22 }
 0x10e   :  { %v198_v25 = vadd.f32 %v195_v23, %v173_v24 }
 0x110   :  { %v205_v27 = vadd.f32 %v203_v26, %v198_v25 }
 0x112   :  { %v1692_v28 = vmax.f32 %v205_v27, 0.0 }
 0x114   :  { %227 = vmatpush.msrb.mxu1 %v1692_v28  ;;  %254 = vmatpush.msrb.mxu3 %v1692_v28 }
 0x115   :  { %300 = vmatpush.msra.mxu0 %v1692_v28  ;;  %1337 = vmatmul.msk.f32.vlgmr.msrb.gmra.mxu1 %vm208_vm7, %v207_v29 }
 0x116   :  { %1340 = vmatmul.msk.f32.vlgmr.msrb.gmra.mxu3 %vm208_vm7, %v1339_v30  ;;  %1345 = vmatpush.msk.msra.mxu1 %vm1667_vm4, %v1529_v9 }
 0x117   :  { %1353 = vmatpush.msk.msrb.mxu0 %vm1643_vm2, %v1529_v9  ;;  %1349 = vmatpush.msk.msra.mxu3 %vm77_vm0, %v1348_v32 }
 0x118   :  { %1346 = vmatpush.msk.msra.mxu1 %vm1671_vm5, %v1529_v9  ;;  %1344 = vmatmul.msk.f32.vlgmr.msra.gmra.mxu0 %vm208_vm7, %v1338_v31 }
 0x119   :  { %1354 = vmatpush.msk.msrb.mxu0 %vm1650_vm3, %v1529_v9  ;;  %1358 = vmatpush.msk.msrb.mxu3 %vm1667_vm4, %v1529_v9 }
 0x11a   :  { %1356 = vmatpush.msk.msrb.mxu1 %vm77_vm0, %v1348_v32 }
 0x11b   :  { %1359 = vmatpush.msk.msrb.mxu3 %vm1671_vm5, %v1529_v9 }
 0x11e   :  { %1350 = vmatmul.msk.f32.vlgmr.msra.gmra.mxu3 %vm73_vm1, %v1629_v1 }
 0x192   :  { %v229_v33 = vpop.f32.mrf.mxu1 }
 0x193   :  { %1343 = vmatmul.msk.f32.vlgmr.msrb.gmra.mxu2 %vm128_vm6, %v229_v33 }
 0x195   :  { %v302_v40 = vpop.f32.mrf.mxu0 }
 0x199   :  { %v256_v34 = vpop.f32.mrf.mxu3 }
 0x19a   :  { %1347 = vmatmul.msk.f32.vlgmr.msra.gmra.mxu1 %vm128_vm6, %v256_v34 }
 0x19b   :  { %1352 = vmatmul.msk.f32.vlgmr.msra.gmra.mxu2 %vm73_vm1, %v1634_v2  ;;  %1363 = vmatpush.msk.msra.mxu1 %vm1643_vm2, %v1529_v9 }
 0x19d   :  { %1364 = vmatpush.msk.msra.mxu1 %vm1650_vm3, %v1529_v9 }
 0x1a1   :  { %v358_v35 = vpop.f32.mrf.mxu3 }
 0x1a2   :  { %1357 = vmatmul.msk.f32.vlgmr.msrb.gmra.mxu1 %vm73_vm1, %v1325_v11  ;;  %1355 = vmatmul.msk.f32.vlgmr.msrb.gmra.mxu0 %vm128_vm6, %v358_v35  ;;  %v1803_v11 = vld [vmem:[%s1938_s5] sm:$0xff] }
 0x1a3   :  { %613 = vmatpush.msrb.mxu1 %v559_v38 }
 0x1a5   :  { %614 = vmatpush.msrb.mxu1 %v558_v39 }
 0x216   :  { %v279_v36 = vpop.f32.mrf.mxu2 }
 0x217   :  { %v325_v41 = vpop.f32.mrf.mxu1  ;;  %v303_v49 = vadd.f32 %v302_v40, %v279_v36 }
 0x219   :  { %v328_v50 = vadd.f32 %v325_v41, %v303_v49 }
 0x21b   :  { %v335_v52 = vadd.f32 %v333_v51, %v328_v50 }
 0x21e   :  { %v378_v37 = vpop.f32.mrf.mxu2 }
 0x21f   :  { %1360 = vmatmul.msk.f32.vlgmr.msrb.gmra.mxu3 %vm128_vm6, %v378_v37  ;;  %v401_v42 = vpop.f32.mrf.mxu0  ;;  %v421_v43 = vpop.f32.mrf.mxu1  ;;  %v629_v37 = vld [vmem:[%s1946_s13] sm:$0x1]  ;;  %s1537_s13 = smov 4  }
 0x220   :  { %v422_v44 = vadd.f32 %v421_v43, %v401_v42  ;;  %v630_v40 = vmul.f32 0.81, %v629_v37  ;;  %v876_v37 = vpop.permute.xlu1 %875 }
 0x2a2   :  { %v444_v45 = vpop.f32.mrf.mxu3 }
 0x2a3   :  { %v447_v46 = vadd.f32 %v444_v45, %v422_v44  ;;  %v1531_v44 = vmov 0.05   ;;  %v1532_v45 = vmov 0.95  }
 0x2a5   :  { %v448_v47 = vadd.f32 %v447_v46, %v203_v26 }
 0x2a7   :  { %v1754_v48 = vmax.f32 %v448_v47, 0.0 }
 0x2a9   :  { %465 = vmatpush.msrb.mxu2 %v1754_v48  ;;  %485 = vmatpush.msra.mxu0 %v1754_v48 }
 0x2aa   :  { %528 = vmatpush.msra.mxu3 %v1754_v48  ;;  %1361 = vmatmul.msk.f32.vlgmr.msrb.gmra.mxu2 %vm208_vm7, %v207_v29 }
 0x2ab   :  { %1362 = vmatmul.msk.f32.vlgmr.msra.gmra.mxu0 %vm208_vm7, %v1339_v30  ;;  %1367 = vmatpush.msk.msra.mxu2 %vm1667_vm4, %v1529_v9  ;;  %v1836_v30 = vld [vmem:[%s1938_s5 + $0x8] sm:$0xff]  ;;  %s1276_s5 = sshll.u32 %s1947_s14, 4  ;;  %s1277_s5 = int_to_ptr.hbm [resolvable:$true] %s1276_s5 }
 0x2ac   :  { %581 = vmatpush.msrb.mxu0 %v559_v38  ;;  %1366 = vmatmul.msk.f32.vlgmr.msra.gmra.mxu3 %vm208_vm7, %v1338_v31 }
 0x2ad   :  { %1368 = vmatpush.msk.msra.mxu2 %vm1671_vm5, %v1529_v9  ;;  %717 = vmatpush.msrb.mxu3 %v696_v53 }
 0x2ae   :  { %582 = vmatpush.msrb.mxu0 %v558_v39 }
 0x2af   :  { %740 = vmatpush.msrb.mxu2 %v696_v53  ;;  %718 = vmatpush.msrb.mxu3 %v695_v54 }
 0x2b1   :  { %741 = vmatpush.msrb.mxu2 %v695_v54  ;;  %719 = vmatpush.msrb.mxu3 %v694_v55 }
 0x2b3   :  { %1370 = vmatmul.msk.f32.vlgmr.msrb.gmra.mxu0 %vm128_vm6, %v335_v52  ;;  %742 = vmatpush.msrb.mxu2 %v694_v55 }
 0x2b4   :  { %720 = vmatpush.msrb.mxu3 %v693_v56 }
 0x2b5   :  { %743 = vmatpush.msrb.mxu2 %v693_v56 }
 0x2b6   :  { %1381 = vmatpush.msk.msra.mxu3 %vm1643_vm2, %v1529_v9 }
 0x2b8   :  { %1382 = vmatpush.msk.msra.mxu3 %vm1650_vm3, %v1529_v9 }
 0x328   :  { %v487_v57 = vpop.f32.mrf.mxu0 }
 0x329   :  { %1369 = vmatmul.msk.f32.vlgmr.msra.gmra.mxu2 %vm128_vm6, %v487_v57 }
 0x32d   :  { %v467_v58 = vpop.f32.mrf.mxu2 }
 0x32e   :  { %1365 = vmatmul.msk.f32.vlgmr.msra.gmra.mxu1 %vm128_vm6, %v467_v58 }
 0x32f   :  { %v530_v63 = vpop.f32.mrf.mxu3 }
 0x330   :  { %v584_v60 = vpop.f32.mrf.mxu0 }
 0x331   :  { %v585_v61 = vadd.f32 %v1439_v59, %v584_v60 }
 0x333   :  { %v587_v62 = vmax.f32 %v585_v61, 0.0 }
 0x335   :  { %1373 = vmatmul.msk.f32.vlgmr.msrb.gmra.mxu3 %vm701_vm8, %v587_v62  ;;  %v589_v14 = vsel %vm588_vm9, %v587_v62, 0.0 }
 0x336   :  { %v590_v17 = vrot.slane %v589_v14, 4 }
 0x338   :  { %v591_v18 = vadd.f32 %v590_v17, %v589_v14 }
 0x33a   :  { %v592_v22 = vrot.slane %v591_v18, 2 }
 0x33c   :  { %v593_v25 = vadd.f32 %v592_v22, %v591_v18 }
 0x33e   :  { %v594_v32 = vrot.slane %v593_v25, 1 }
 0x340   :  { %v595_v35 = vadd.f32 %v594_v32, %v593_v25 }
 0x3ab   :  { %v510_v0 = vpop.f32.mrf.mxu1 }
 0x3ac   :  { %v531_v1 = vadd.f32 %v530_v63, %v510_v0  ;;  %v553_v2 = vpop.f32.mrf.mxu2 }
 0x3ae   :  { %v556_v3 = vadd.f32 %v553_v2, %v531_v1 }
 0x3b0   :  { %v557_v4 = vadd.f32 %v556_v3, %v333_v51 }
 0x3b2   :  { %1371 = vmatmul.msk.f32.vlgmr.msrb.gmra.mxu1 %vm128_vm6, %v557_v4 }
 0x3b8   :  { %v722_v6 = vpop.f32.mrf.mxu3 }
 0x3b9   :  { %v723_v7 = vadd.f32 %v1797_v5, %v722_v6 }
 0x3bb   :  { %1375 = vmatpush.msk.msra.mxu0 %vm77_vm0, %v723_v7  ;;  %1379 = vmatpush.msk.msra.mxu1 %vm77_vm0, %v723_v7 }
 0x3bc   :  { %1384 = vmatpush.msk.msra.mxu2 %vm77_vm0, %v723_v7  ;;  %1376 = vmatmul.msk.f32.vlgmr.msra.gmra.mxu0 %vm73_vm1, %v1803_v11 }
 0x3bd   :  { %1380 = vmatmul.msk.f32.vlgmr.msra.gmra.mxu1 %vm73_vm1, %v1808_v12  ;;  %1386 = vmatpush.msk.msrb.mxu0 %vm1667_vm4, %v1529_v9 }
 0x3bf   :  { %1387 = vmatpush.msk.msrb.mxu0 %vm1671_vm5, %v1529_v9 }
 0x42f   :  { %v616_v19 = vpop.f32.mrf.mxu1 }
 0x430   :  { %v617_v20 = vadd.f32 %v1439_v59, %v616_v19 }
 0x432   :  { %v619_v21 = vmax.f32 %v617_v20, 0.0 }
 0x434   :  { %v620_v23 = vsel %vm588_vm9, %v619_v21, 0.0  ;;  %1374 = vmatmul.msk.f32.vlgmr.msrb.gmra.mxu2 %vm701_vm8, %v619_v21  ;;  %vm1009_vm9 = vcmask 125952  }
 0x435   :  { %v621_v24 = vrot.slane %v620_v23, 4  ;;  %1393 = vmatpush.msk.msrb.mxu2 %vm1643_vm2, %v1529_v9 }
 0x437   :  { %v622_v26 = vadd.f32 %v621_v24, %v620_v23  ;;  %1394 = vmatpush.msk.msrb.mxu2 %vm1650_vm3, %v1529_v9 }
 0x439   :  { %v623_v27 = vrot.slane %v622_v26, 2  ;;  %v772_v29 = vpop.f32.mrf.mxu0 }
 0x43a   :  { %1383 = vmatmul.msk.f32.vlgmr.msra.gmra.mxu3 %vm128_vm6, %v772_v29  ;;  %v799_v31 = vpop.f32.mrf.mxu1 }
 0x43b   :  { %v624_v33 = vadd.f32 %v623_v27, %v622_v26  ;;  %1388 = vmatmul.msk.f32.vlgmr.msrb.gmra.mxu0 %vm128_vm6, %v799_v31 }
 0x43c   :  { %1385 = vmatmul.msk.f32.vlgmr.msra.gmra.mxu2 %vm73_vm1, %v1836_v30 }
 0x43d   :  { %v625_v34 = vrot.slane %v624_v33, 1 }
 0x43f   :  { %v626_v36 = vadd.f32 %v625_v34, %v624_v33 }
 0x441   :  { %v627_v38 = vadd.f32 %v626_v36, %v595_v35 }
 0x443   :  { %v628_v39 = vmul.f32 0.125, %v627_v38 }
 0x445   :  { %v631_v41 = vmul.f32 0.19, %v628_v39 }
 0x447   :  { %v632_v42 = vadd.f32 %v631_v41, %v630_v40  ;;  %v881_v41 = vld [vmem:[%s1940_s7] sm:$0xf] }
 0x449   :  { %v1372_v43 = vmul.f32 -1.442695, %v632_v42  ;;  %634 = vst.msk [vmem:[#allocation6] sm:$0x1] %vm633_vm10, %v632_v42 }
 0x44b   :  { %1441 = vpow2.f32 %v1372_v43 }
 0x44c   :  { %1443 = vrcp.f32 %v1531_v44 }
 0x44d   :  { %1445 = vrcp.f32 %v1532_v45 }
 0x451   :  { %v1442_v46 = vpop.eup %1441 }
 0x452   :  { %v638_v47 = vadd.f32 1.0, %v1442_v46  ;;  %v1444_v49 = vpop.eup %1443 }
 0x453   :  { %v1446_v50 = vpop.eup %1445  ;;  %v657_v51 = vmul.f32 0.05, %v1444_v49  ;;  %vm661_vm15 = vweird.f32 %v1444_v49 }
 0x454   :  { %1447 = vrcp.f32 %v638_v47  ;;  %v669_v52 = vmul.f32 0.95, %v1446_v50  ;;  %v650_v58 = vand.u32 2147483648, %v638_v47  ;;  %v648_v61 = vand.u32 2147483647, %v638_v47 }
 0x455   :  { %v658_v54 = vsub.f32 1.0, %v657_v51  ;;  %vm644_vm12 = vweird.f32 %v638_v47  ;;  %vm673_vm8 = vweird.f32 %v1446_v50 }
 0x456   :  { %v670_v56 = vsub.f32 1.0, %v669_v52  ;;  %v651_v0 = vor.u32 1.1754944e-38, %v650_v58  ;;  %vm649_vm14 = vcmp.eq.f32.partialorder %v648_v61, 8.507059e+37 }
 0x457   :  { %v659_v59 = vmul.f32 %v1444_v49, %v658_v54 }
 0x458   :  { %v671_v62 = vmul.f32 %v1446_v50, %v670_v56 }
 0x459   :  { %v660_v1 = vadd.f32 %v1444_v49, %v659_v59 }
 0x45a   :  { %v1448_v53 = vpop.eup %1447  ;;  %v672_v4 = vadd.f32 %v1446_v50, %v671_v62 }
 0x45b   :  { %v640_v55 = vmul.f32 %v1448_v53, %v638_v47  ;;  %vm645_vm11 = vweird.f32 %v1448_v53  ;;  %v662_v7 = vsel %vm661_vm15, %v1444_v49, %v660_v1  ;;  %v1390_v49 = vld [vmem:[%s1940_s7 + $0x4] sm:$0xf] }
 0x45c   :  { %vm646_vm13 = vmor %vm644_vm12, %vm645_vm11  ;;  %v674_v14 = vsel %vm673_vm8, %v1446_v50, %v672_v4  ;;  %v1416_v4 = vld [vmem:[%s1940_s7 + $0x8] sm:$0xf] }
 0x45d   :  { %v641_v57 = vsub.f32 1.0, %v640_v55 }
 0x45f   :  { %v642_v60 = vmul.f32 %v1448_v53, %v641_v57 }
 0x461   :  { %v643_v63 = vadd.f32 %v1448_v53, %v642_v60 }
 0x463   :  { %v647_v2 = vsel %vm646_vm13, %v1448_v53, %v643_v63  ;;  %v1137_v63 = vpop.permute.xlu1 %1136 }
 0x464   :  { %v652_v3 = vsel %vm649_vm14, %v651_v0, %v647_v2 }
 0x465   :  { %v654_v6 = vmax.f32 %v652_v3, 1e-06  ;;  %v1142_v3 = vld [vmem:[%s1940_s7] sm:$0xf] }
 0x467   :  { %v655_v13 = vmin.f32 %v654_v6, 0.999999  ;;  %v1415_v6 = vld [vmem:[%s1940_s7 + $0x4] sm:$0xf] }
 0x469   :  { %v663_v17 = vmul.f32 %v662_v7, %v655_v13  ;;  %v667_v18 = vsub.f32 1.0, %v655_v13 }
 0x46b   :  { %1449 = vlog2.f32 %v663_v17  ;;  %v675_v19 = vmul.f32 %v674_v14, %v667_v18  ;;  %v1265_v17 = vpop.permute.xlu0 %1264 }
 0x46d   :  { %1451 = vlog2.f32 %v675_v19 }
 0x471   :  { %v1450_v20 = vpop.eup %1449 }
 0x472   :  { %v665_v21 = vmul.f32 0.6931472, %v1450_v20 }
 0x473   :  { %v1452_v22 = vpop.eup %1451 }
 0x474   :  { %v677_v23 = vmul.f32 0.6931472, %v1452_v22  ;;  %v666_v24 = vmul.f32 %v665_v21, %v655_v13 }
 0x476   :  { %v678_v25 = vmul.f32 %v677_v23, %v667_v18 }
 0x478   :  { %v679_v26 = vadd.f32 %v678_v25, %v666_v24 }
 0x47a   :  { %v680_v27 = vsel %vm633_vm10, %v679_v26, 0.0 }
 0x47b   :  { %681 = vadd.xlane.f32.xlu2 %v680_v27 }
 0x4b7   :  { %v745_v29 = vpop.f32.mrf.mxu2 }
 0x4b8   :  { %v746_v31 = vadd.f32 %v1797_v5, %v745_v29  ;;  %v868_v34 = vpop.f32.mrf.mxu0  ;;  %v1391_v5 = vld [vmem:[%s1940_s7 + $0x8] sm:$0xf]  ;;  %s1533_s7 = smov [#allocation4]  }
 0x4b9   :  { %s1288_s11 = sshll.u32 %s1533_s7, 4  ;;  %s1289_s11 = int_to_ptr.vmem [resolvable:$true] %s1288_s11 }
 0x4ba   :  { %1404 = vmatpush.msk.msra.mxu2 %vm77_vm0, %v746_v31 }
 0x4bd   :  { %v822_v32 = vpop.f32.mrf.mxu3 }
 0x4bf   :  { %v845_v33 = vpop.f32.mrf.mxu2 }
 0x4c0   :  { %v846_v35 = vadd.f32 %v845_v33, %v822_v32 }
 0x4c2   :  { %v871_v36 = vadd.f32 %v868_v34, %v846_v35 }
 0x4c4   :  { %v878_v38 = vadd.f32 %v876_v37, %v871_v36 }
 0x4c6   :  { %v879_v39 = vmax.f32 %v878_v38, 0.0 }
 0x4c8   :  { %v880_v40 = vadd.f32 %v879_v39, %v1692_v28 }
 0x4ca   :  { %900 = vmatpush.msrb.mxu1 %v880_v40  ;;  %927 = vmatpush.msrb.mxu3 %v880_v40 }
 0x4cb   :  { %973 = vmatpush.msra.mxu0 %v880_v40  ;;  %1389 = vmatmul.msk.f32.vlgmr.msrb.gmra.mxu1 %vm208_vm7, %v881_v41 }
 0x4cc   :  { %1397 = vmatpush.msk.msra.mxu1 %vm1667_vm4, %v1529_v9  ;;  %1400 = vmatpush.msk.msra.mxu3 %vm77_vm0, %v746_v31 }
 0x4cd   :  { %1392 = vmatmul.msk.f32.vlgmr.msrb.gmra.mxu3 %vm208_vm7, %v1391_v5  ;;  %1406 = vmatpush.msk.msrb.mxu0 %vm1643_vm2, %v1529_v9 }
 0x4ce   :  { %1398 = vmatpush.msk.msra.mxu1 %vm1671_vm5, %v1529_v9  ;;  %1411 = vmatpush.msk.msrb.mxu3 %vm1667_vm4, %v1529_v9 }
 0x4cf   :  { %1407 = vmatpush.msk.msrb.mxu0 %vm1650_vm3, %v1529_v9 }
 0x4d0   :  { %1409 = vmatpush.msk.msrb.mxu1 %vm77_vm0, %v746_v31  ;;  %1412 = vmatpush.msk.msrb.mxu3 %vm1671_vm5, %v1529_v9  ;;  %vm691_vm0 = vcmask 0  }
 0x4d1   :  { %1396 = vmatmul.msk.f32.vlgmr.msra.gmra.mxu0 %vm208_vm7, %v1390_v49 }
 0x4d5   :  { %1401 = vmatmul.msk.f32.vlgmr.msra.gmra.mxu3 %vm73_vm1, %v1803_v11  ;;  %v1002_v11 = vld [vmem:[%s1941_s8] sm:$0xf] }
 0x4d6   :  { %1005 = vperm.xlu2 %1438, %v1002_v11  }
 0x4ee   :  { %v682_v28 = vpop.xlane.xlu2 %681 }
 0x4ef   :  { %v683_v42 = vrot.slane %v682_v28, 4 }
 0x4f1   :  { %v684_v43 = vadd.f32 %v683_v42, %v682_v28 }
 0x4f3   :  { %v685_v44 = vrot.slane %v684_v43, 2 }
 0x4f5   :  { %v686_v45 = vadd.f32 %v685_v44, %v684_v43 }
 0x4f7   :  { %v687_v46 = vrot.slane %v686_v45, 1 }
 0x4f9   :  { %v688_v47 = vadd.f32 %v687_v46, %v686_v45 }
 0x4fb   :  { %1425 = vpush %v688_v47 }
 0x52c   :  { %s1426_s30 = spop %1425 }
 0x52d   :  { %v690_v50 = vstv %s1426_s30 }
 0x52e   :  { %692 = vst.msk [vmem:[#allocation4] sm:$0x1] %vm691_vm0, %v690_v50 }
 0x52f   :  { %1293 = dma.vmem_to_hbm [thread:$0]  %s1289_s11, 16, %s1291_s21, [#allocation5]  }
 0x530   :  { %v1006_v58 = vpop.permute.xlu2 %1005  ;;  %1304 = dma.vmem_to_hbm [thread:$0]  %s1300_s24, 16, %s1302_s6, [#allocation5]  }
 0x548   :  { %v902_v51 = vpop.f32.mrf.mxu1 }
 0x549   :  { %1395 = vmatmul.msk.f32.vlgmr.msrb.gmra.mxu2 %vm128_vm6, %v902_v51 }
 0x54e   :  { %v975_v54 = vpop.f32.mrf.mxu0 }
 0x550   :  { %v929_v52 = vpop.f32.mrf.mxu3 }
 0x551   :  { %1399 = vmatmul.msk.f32.vlgmr.msra.gmra.mxu1 %vm128_vm6, %v929_v52  ;;  %1405 = vmatmul.msk.f32.vlgmr.msra.gmra.mxu2 %vm73_vm1, %v1808_v12 }
 0x552   :  { %1418 = vmatpush.msk.msra.mxu1 %vm1643_vm2, %v1529_v9 }
 0x554   :  { %1419 = vmatpush.msk.msra.mxu1 %vm1650_vm3, %v1529_v9 }
 0x558   :  { %v1035_v53 = vpop.f32.mrf.mxu3 }
 0x559   :  { %1410 = vmatmul.msk.f32.vlgmr.msrb.gmra.mxu1 %vm73_vm1, %v1836_v30  ;;  %1408 = vmatmul.msk.f32.vlgmr.msrb.gmra.mxu0 %vm128_vm6, %v1035_v53 }
 0x5cc   :  { %v952_v55 = vpop.f32.mrf.mxu2 }
 0x5cd   :  { %v976_v56 = vadd.f32 %v975_v54, %v952_v55 }
 0x5ce   :  { %v998_v57 = vpop.f32.mrf.mxu1 }
 0x5cf   :  { %v1001_v12 = vadd.f32 %v998_v57, %v976_v56 }
 0x5d1   :  { %v1008_v59 = vadd.f32 %v1006_v58, %v1001_v12 }
 0x5d3   :  { %1010 = vst.msk [vmem:[#allocation2] sm:$0xf] %vm1009_vm9, %v1008_v59 }
 0x5d4   :  { %v1060_v8 = vpop.f32.mrf.mxu2 }
 0x5d5   :  { %1413 = vmatmul.msk.f32.vlgmr.msrb.gmra.mxu3 %vm128_vm6, %v1060_v8 }
 0x5d6   :  { %v1083_v10 = vpop.f32.mrf.mxu0  ;;  %v1106_v60 = vpop.f32.mrf.mxu1 }
 0x5d7   :  { %v1107_v61 = vadd.f32 %v1106_v60, %v1083_v10 }
 0x658   :  { %v1129_v30 = vpop.f32.mrf.mxu3 }
 0x659   :  { %v1132_v62 = vadd.f32 %v1129_v30, %v1107_v61 }
 0x65b   :  { %v1139_v0 = vadd.f32 %v1137_v63, %v1132_v62 }
 0x65d   :  { %v1140_v1 = vmax.f32 %v1139_v0, 0.0 }
 0x65f   :  { %v1141_v2 = vadd.f32 %v1140_v1, %v1754_v48 }
 0x661   :  { %1161 = vmatpush.msrb.mxu2 %v1141_v2  ;;  %1186 = vmatpush.msra.mxu0 %v1141_v2 }
 0x662   :  { %1232 = vmatpush.msra.mxu3 %v1141_v2  ;;  %1414 = vmatmul.msk.f32.vlgmr.msrb.gmra.mxu2 %vm208_vm7, %v1142_v3 }
 0x663   :  { %1417 = vmatmul.msk.f32.vlgmr.msra.gmra.mxu0 %vm208_vm7, %v1416_v4  ;;  %1422 = vmatpush.msk.msra.mxu2 %vm1667_vm4, %v1529_v9 }
 0x664   :  { %1421 = vmatmul.msk.f32.vlgmr.msra.gmra.mxu3 %vm208_vm7, %v1415_v6 }
 0x665   :  { %1423 = vmatpush.msk.msra.mxu2 %vm1671_vm5, %v1529_v9 }
 0x6e0   :  { %v1188_v48 = vpop.f32.mrf.mxu0 }
 0x6e1   :  { %1424 = vmatmul.msk.f32.vlgmr.msra.gmra.mxu2 %vm128_vm6, %v1188_v48 }
 0x6e5   :  { %v1163_v7 = vpop.f32.mrf.mxu2 }
 0x6e6   :  { %1420 = vmatmul.msk.f32.vlgmr.msra.gmra.mxu1 %vm128_vm6, %v1163_v7 }
 0x6e7   :  { %v1234_v9 = vpop.f32.mrf.mxu3 }
 0x763   :  { %v1211_v15 = vpop.f32.mrf.mxu1 }
 0x764   :  { %v1235_v16 = vadd.f32 %v1234_v9, %v1211_v15  ;;  %v1257_v13 = vpop.f32.mrf.mxu2 }
 0x766   :  { %v1260_v14 = vadd.f32 %v1257_v13, %v1235_v16 }
 0x768   :  { %v1267_v18 = vadd.f32 %v1265_v17, %v1260_v14 }
 0x76a   :  { %1269 = vst.msk [vmem:[#allocation2 + $0x4] sm:$0xf] %vm1009_vm9, %v1267_v18 }
 0x76b   :  { %1282 = dma.vmem_to_hbm [thread:$0]  %s1275_s3, 128, %s1277_s5, [#allocation3], %s1536_s16, %s1536_s16, %s1537_s13  }
 0x76c   :  { %1525 = dma.done.wait [#allocation3], 128  }
 0x76d   :  { %1526 = vsyncadd [#allocation3], 4294967168 }
 0x76e   :  { %1527 = dma.done.wait [#allocation5], 32  }
 0x76f   :  { %1528 = vsyncadd [#allocation5], 4294967264 }
 0x770   :  { %1317 = vsyncpa [#allocation3], 1 }
 0x771   :  { %1318 = vsyncpa [#allocation5], 1 }

</bundles_post_ra>
